<compile_context>
chip_gen: v7x
topology: tpu7x:2x2x1
jax: 0.10.0
libtpu: 0.0.40
codegen_flags: <defaults>
</compile_context>

<pallas_src>
import jax
import jax.numpy as jnp
from jax.experimental import pallas as pl
from jax.experimental.pallas import tpu as pltpu


def mlp_kernel(x_ref, w1_ref, b1_ref, w2_ref, b2_ref, o_ref, acc_ref):
    """One hidden-dim tile: h_k = relu(x @ W1[:, k] + b1[k]); acc += h_k @ W2[k, :]."""
    k = pl.program_id(0)

    # Seed the accumulator with the output bias on the first reduction step.
    @pl.when(k == 0)
    def _():
        acc_ref[...] = jnp.broadcast_to(b2_ref[...], acc_ref.shape)

    # Weights are stored as bf16 (bandwidth win); upcast in VMEM so the matmul
    # math remains f32.
    w1 = w1_ref[...].astype(jnp.float32)
    w2 = w2_ref[...].astype(jnp.float32)

    h = jnp.dot(x_ref[...], w1, preferred_element_type=jnp.float32)  # (B, TK)
    h = jnp.maximum(h + b1_ref[...], 0.0)
    acc_ref[...] += jnp.dot(h, w2, preferred_element_type=jnp.float32)

    # Write back only on the last reduction step (output block is resident).
    @pl.when(k == pl.num_programs(0) - 1)
    def _():
        o_ref[...] = acc_ref[...].astype(o_ref.dtype)


def _pick_hidden_tile(d):
    """Largest lane-aligned tile (multiple of 128) that evenly divides d."""
    for tk in (512, 384, 256, 128):
        if d % tk == 0:
            return tk
    return d  # fall back to a single step


def latent_network_forward(x, w1_t, b1, w2_t, b2):
    """Fused Linear -> ReLU -> Linear.

    x    : (B, D)  f32
    w1_t : (D, D)  bf16, (in, hidden) layout (pre-transposed once at setup)
    b1   : (D,)    f32
    w2_t : (D, D)  bf16, (hidden, out) layout
    b2   : (D,)    f32
    """
    B, D = x.shape
    TK = _pick_hidden_tile(D)
    nk = D // TK

    b1_2d = b1.reshape(1, D)
    b2_2d = b2.reshape(1, D)

    wbytes = jnp.dtype(w1_t.dtype).itemsize
    cost = pl.CostEstimate(
        flops=2 * 2 * B * D * D,          # two (B,D)x(D,D) matmuls
        transcendentals=0,
        bytes_accessed=2 * D * D * wbytes + 2 * B * D * 4 + 2 * D * 4,
    )

    return pl.pallas_call(
        mlp_kernel,
        out_shape=jax.ShapeDtypeStruct((B, D), x.dtype),
        grid_spec=pltpu.PrefetchScalarGridSpec(
            num_scalar_prefetch=0,
            grid=(nk,),
            in_specs=[
                pl.BlockSpec((B, D), lambda k: (0, 0)),     # x (resident)
                pl.BlockSpec((D, TK), lambda k: (0, k)),    # W1^T column tile
                pl.BlockSpec((1, TK), lambda k: (0, k)),    # b1 tile
                pl.BlockSpec((TK, D), lambda k: (k, 0)),    # W2^T row tile
                pl.BlockSpec((1, D), lambda k: (0, 0)),     # b2 (resident)
            ],
            out_specs=pl.BlockSpec((B, D), lambda k: (0, 0)),
            scratch_shapes=[pltpu.VMEM((B, D), jnp.float32)],
        ),
        compiler_params=pltpu.CompilerParams(
            dimension_semantics=("arbitrary",),  # hidden-dim reduction axis
        ),
        cost_estimate=cost,
    )(x, w1_t, b1_2d, w2_t, b2_2d)


def init_params(key, dim):
    """PyTorch nn.Linear default init (U(-1/sqrt(in), 1/sqrt(in))), (out, in) layout."""
    k1, k2, k3, k4 = jax.random.split(key, 4)
    bound = 1.0 / jnp.sqrt(dim)
    w1 = jax.random.uniform(k1, (dim, dim), jnp.float32, -bound, bound)
    b1 = jax.random.uniform(k2, (dim,), jnp.float32, -bound, bound)
    w2 = jax.random.uniform(k3, (dim, dim), jnp.float32, -bound, bound)
    b2 = jax.random.uniform(k4, (dim,), jnp.float32, -bound, bound)
    return w1, b1, w2, b2


def prepare_params(w1, b1, w2, b2):
    """One-time setup: transpose to (in, out) layout and cast weights to bf16.

    Done once (not per forward call), so there are no per-call transpose ops
    and the streamed weight bytes are halved.
    """
    w1_t = jnp.transpose(w1).astype(jnp.bfloat16)
    w2_t = jnp.transpose(w2).astype(jnp.bfloat16)
    return w1_t, b1, w2_t, b2


if __name__ == "__main__":
    # Module config analogue: params['nz'] -> small nz=16, so dim = 72*16 = 1152.
    nz = 16
    dim = 72 * nz
    batch = 8

    key = jax.random.PRNGKey(0)
    kx, kp = jax.random.split(key)
    x = jax.random.normal(kx, (batch, dim), jnp.float32)
    w1, b1, w2, b2 = init_params(kp, dim)
    w1_t, b1, w2_t, b2 = prepare_params(w1, b1, w2, b2)

    fwd = jax.jit(latent_network_forward)
    out = jax.block_until_ready(fwd(x, w1_t, b1, w2_t, b2))

    # Pure-JAX reference: same bf16-stored weights upcast to f32 (so weight
    # quantization cancels and the check stays tight); high-precision dots.
    w1f = w1_t.astype(jnp.float32)
    w2f = w2_t.astype(jnp.float32)
    hp = jax.lax.Precision.HIGHEST
    h_ref = jnp.maximum(jnp.dot(x, w1f, precision=hp) + b1, 0.0)
    ref = jnp.dot(h_ref, w2f, precision=hp) + b2

    assert out.shape == (batch, dim)
    assert jnp.allclose(out, ref, atol=1e-3, rtol=1e-3), float(
        jnp.max(jnp.abs(out - ref)))

    print("KERNEL_OK")
</pallas_src>

<mosaic_0001>
module attributes {stable_mosaic.version = 11 : i64} {
  func.func @mlp_kernel(%arg0: i32, %arg1: memref<8x1152xf32, #tpu.memory_space<vmem>>, %arg2: memref<1152x384xbf16, #tpu.memory_space<vmem>>, %arg3: memref<1x384xf32, #tpu.memory_space<vmem>>, %arg4: memref<384x1152xbf16, #tpu.memory_space<vmem>>, %arg5: memref<1x1152xf32, #tpu.memory_space<vmem>>, %arg6: memref<8x1152xf32, #tpu.memory_space<vmem>>, %arg7: memref<8x1152xf32, #tpu.memory_space<vmem>>) attributes {dimension_semantics = [#tpu.dimension_semantics<arbitrary>], iteration_bounds = array<i64: 3>, scalar_prefetch = 0 : i64, scratch_operands = 1 : i64, tpu.core_type = #tpu.core_type<tc>, window_params = [{pipeline_mode = #tpu.pipeline_mode<synchronous>, transform_indices = @transform_0, window_bounds = array<i64: 8, 1152>}, {transform_indices = @transform_1, window_bounds = array<i64: 1152, 384>}, {transform_indices = @transform_2, window_bounds = array<i64: 1, 384>}, {transform_indices = @transform_3, window_bounds = array<i64: 384, 1152>}, {pipeline_mode = #tpu.pipeline_mode<synchronous>, transform_indices = @transform_4, window_bounds = array<i64: 1, 1152>}, {pipeline_mode = #tpu.pipeline_mode<synchronous>, transform_indices = @transform_5, window_bounds = array<i64: 8, 1152>}]} {
    %c0_i32 = arith.constant 0 : i32
    %0 = arith.cmpi eq, %arg0, %c0_i32 : i32
    %1 = arith.extui %0 : i1 to i32
    %c0_i32_0 = arith.constant 0 : i32
    %2 = arith.cmpi ne, %1, %c0_i32_0 : i32
    scf.if %2 {
      %c0_15 = arith.constant 0 : index
      %c0_16 = arith.constant 0 : index
      %21 = vector.load %arg5[%c0_15, %c0_16] : memref<1x1152xf32, #tpu.memory_space<vmem>>, vector<1x1152xf32>
      %22 = vector.shape_cast %21 : vector<1x1152xf32> to vector<1x1152xf32>
      %23 = vector.broadcast %22 : vector<1x1152xf32> to vector<8x1152xf32>
      %c0_17 = arith.constant 0 : index
      %c0_18 = arith.constant 0 : index
      %24 = vector.load %arg7[%c0_17, %c0_18] : memref<8x1152xf32, #tpu.memory_space<vmem>>, vector<8x1152xf32>
      tpu.vector_store %arg7[%c0_17, %c0_18], %23 {strides = array<i32>} : memref<8x1152xf32, #tpu.memory_space<vmem>>, vector<8x1152xf32>,
    } else {
    }
    %c0 = arith.constant 0 : index
    %c0_1 = arith.constant 0 : index
    %3 = vector.load %arg2[%c0, %c0_1] : memref<1152x384xbf16, #tpu.memory_space<vmem>>, vector<1152x384xbf16>
    %4 = arith.extf %3 : vector<1152x384xbf16> to vector<1152x384xf32>
    %c0_2 = arith.constant 0 : index
    %c0_3 = arith.constant 0 : index
    %5 = vector.load %arg4[%c0_2, %c0_3] : memref<384x1152xbf16, #tpu.memory_space<vmem>>, vector<384x1152xbf16>
    %6 = arith.extf %5 : vector<384x1152xbf16> to vector<384x1152xf32>
    %c0_4 = arith.constant 0 : index
    %c0_5 = arith.constant 0 : index
    %7 = vector.load %arg1[%c0_4, %c0_5] : memref<8x1152xf32, #tpu.memory_space<vmem>>, vector<8x1152xf32>
    %cst = arith.constant dense<0.000000e+00> : vector<8x384xf32>
    %8 = tpu.matmul %7, %4, %cst {dimension_numbers = #tpu.dot_dimension_numbers<[1], [0], [0], [1], [0, 0, 1, 1], [], []>} : vector<8x1152xf32>, vector<1152x384xf32>, vector<8x384xf32> -> vector<8x384xf32>
    %c0_6 = arith.constant 0 : index
    %c0_7 = arith.constant 0 : index
    %9 = vector.load %arg3[%c0_6, %c0_7] : memref<1x384xf32, #tpu.memory_space<vmem>>, vector<1x384xf32>
    %10 = vector.broadcast %9 : vector<1x384xf32> to vector<8x384xf32>
    %11 = arith.addf %8, %10 : vector<8x384xf32>
    %cst_8 = arith.constant 0.000000e+00 : f32
    %12 = vector.broadcast %cst_8 : f32 to vector<8x384xf32>
    %13 = arith.maximumf %11, %12 : vector<8x384xf32>
    %c0_9 = arith.constant 0 : index
    %c0_10 = arith.constant 0 : index
    %14 = vector.load %arg7[%c0_9, %c0_10] : memref<8x1152xf32, #tpu.memory_space<vmem>>, vector<8x1152xf32>
    %cst_11 = arith.constant dense<0.000000e+00> : vector<8x1152xf32>
    %15 = tpu.matmul %13, %6, %cst_11 {dimension_numbers = #tpu.dot_dimension_numbers<[1], [0], [0], [1], [0, 0, 1, 1], [], []>} : vector<8x384xf32>, vector<384x1152xf32>, vector<8x1152xf32> -> vector<8x1152xf32>
    %16 = arith.addf %14, %15 : vector<8x1152xf32>
    %c0_12 = arith.constant 0 : index
    %c0_13 = arith.constant 0 : index
    %17 = vector.load %arg7[%c0_12, %c0_13] : memref<8x1152xf32, #tpu.memory_space<vmem>>, vector<8x1152xf32>
    tpu.vector_store %arg7[%c0_12, %c0_13], %16 {strides = array<i32>} : memref<8x1152xf32, #tpu.memory_space<vmem>>, vector<8x1152xf32>,
    %c2_i32 = arith.constant 2 : i32
    %18 = arith.cmpi eq, %arg0, %c2_i32 : i32
    %19 = arith.extui %18 : i1 to i32
    %c0_i32_14 = arith.constant 0 : i32
    %20 = arith.cmpi ne, %19, %c0_i32_14 : i32
    scf.if %20 {
      %c0_15 = arith.constant 0 : index
      %c0_16 = arith.constant 0 : index
      %21 = vector.load %arg7[%c0_15, %c0_16] : memref<8x1152xf32, #tpu.memory_space<vmem>>, vector<8x1152xf32>
      %c0_17 = arith.constant 0 : index
      %c0_18 = arith.constant 0 : index
      %22 = vector.load %arg6[%c0_17, %c0_18] : memref<8x1152xf32, #tpu.memory_space<vmem>>, vector<8x1152xf32>
      tpu.vector_store %arg6[%c0_17, %c0_18], %21 {strides = array<i32>} : memref<8x1152xf32, #tpu.memory_space<vmem>>, vector<8x1152xf32>,
    } else {
    }
    return
  }
  func.func @transform_0(%arg0: i32) -> (i32, i32) {
    %c0_i32 = arith.constant 0 : i32
    %c0_i32_0 = arith.constant 0 : i32
    %c0_i32_1 = arith.constant 0 : i32
    return %c0_i32, %c0_i32_0 : i32, i32
  }
  func.func @transform_1(%arg0: i32) -> (i32, i32) {
    %c0_i32 = arith.constant 0 : i32
    %c0_i32_0 = arith.constant 0 : i32
    return %c0_i32, %arg0 : i32, i32
  }
  func.func @transform_2(%arg0: i32) -> (i32, i32) {
    %c0_i32 = arith.constant 0 : i32
    %c0_i32_0 = arith.constant 0 : i32
    return %c0_i32, %arg0 : i32, i32
  }
  func.func @transform_3(%arg0: i32) -> (i32, i32) {
    %c0_i32 = arith.constant 0 : i32
    %c0_i32_0 = arith.constant 0 : i32
    return %arg0, %c0_i32 : i32, i32
  }
  func.func @transform_4(%arg0: i32) -> (i32, i32) {
    %c0_i32 = arith.constant 0 : i32
    %c0_i32_0 = arith.constant 0 : i32
    %c0_i32_1 = arith.constant 0 : i32
    return %c0_i32, %c0_i32_0 : i32, i32
  }
  func.func @transform_5(%arg0: i32) -> (i32, i32) {
    %c0_i32 = arith.constant 0 : i32
    %c0_i32_0 = arith.constant 0 : i32
    %c0_i32_1 = arith.constant 0 : i32
    return %c0_i32, %c0_i32_0 : i32, i32
  }
}

</mosaic_0001>

<bundles_post_ra>
// kernel: latent_network_forward.1
= control target key start
LH: loop header
LB: loop body
LE: loop exit
PB: predicated region body
PF: predicated region fallthrough
CT: control target
= control target key end

     0   :  { %10 = vsyncpa [#allocation4], 0  ;;  %s6592_s0 = inlined_call_operand.hbm [shape: f32[8,1152], index: 0, kind: input, shape index: {}]   ;;  %s6593_s1 = inlined_call_operand.hbm [shape: bf16[1152,1152], index: 1, kind: input, shape index: {}]   ;;  %s6594_s2 = inlined_call_operand.vmem [shape: f32[1,1152], index: 2, kind: input, shape index: {}]   ;;  %s6595_s3 = inlined_call_operand.hbm [shape: bf16[1152,1152], index: 3, kind: input, shape index: {}]   ;;  %s6596_s4 = inlined_call_operand.vmem [shape: f32[1,1152], index: 4, kind: input, shape index: {}]   ;;  %s6597_s5 = inlined_call_operand.hbm [shape: f32[8,1152], index: 5, kind: output, shape index: {}]  }
   0x1   :  { %11 = vsyncpa [#allocation7], 0 }
   0x2   :  { %13 = vsyncpa [#allocation7 + $0x1], 0 }
   0x3   :  { %14 = vsyncpa [#allocation5], 0  ;;  %s5844_s18 = smov 0   ;;  %s5846_s19 = smov 0  }
   0x4   :  { %s5848_s20 = smov 0   ;;  %s5850_s21 = smov 0  }
   0x5 LB: > { %s5865_s22 = sadd.s32 1, %s5801_s21   ;;  %s48_s23 = sadd.s32 1, %s5797_s20  ;;  %s5801_s21 = sphi %s5850_s21, %s6619_s21   ;;  %s5797_s20 = sphi %s5848_s20, %s6618_s20   ;;  %s5793_s19 = sphi %s5846_s19, %s6617_s19   ;;  %s5789_s18 = sphi %s5844_s18, %s6616_s18  }
   0x6   : > { %s45_s24 = ssub.s32 %s5801_s21, %s5865_s22  ;;  %p55_p0 = scmp.ne.s32.totalorder %s5797_s20, %s5793_s19 }
   0x7   : > { %p46_p1 = scmp.eq.s32.totalorder %s45_s24, 0  ;;  %p56_p2 = scmp.eq.s32.totalorder %s5801_s21, 0 }
   0x8   : > { %p4999_p3 = scmp.lt.s32.totalorder %s5801_s21, 3  ;;  %s193_s26 = sand.u32 1, %s5801_s21  }
   0x9   : > { %s5875_s25 = scalar_select %p46_p1, %s5797_s20, %s48_s23  }
   0xa   : > { %p57_p4 = por %p56_p2, %p55_p0  ;;  %s195_s27 = sand.u32 1, %s5797_s20  }
   0xb   : > { %s5879_s28 = smul.u32 1728, %s195_s27  ;;  %s5894_s11 = scalar_lea.sflag [#allocation7], %s193_s26 }
   0xc   : > { %p5881_p5 = pnand %p4999_p3, %p57_p4  ;;  %s3361_s30 = smul.u32 192, %s5801_s21 }
   0xd   : > { %s197_s9 = scalar_lea.vmem [#allocation6], %s5879_s28  ;;  %s5650_s15 = scalar_lea.hbm %s6593_s1, 82944 }
   0xe   : > { %s6604_s29 = scalar_select %p5881_p5, 1, 0 }
   0xf   : > { %s5889_s8 = scalar_lea.hbm %s6593_s1, %s3361_s30  ;;  %s204_s10 = sshll.u32 %s197_s9, 4  ;;  %s5892_s10 = int_to_ptr.vmem [resolvable:$true] %s204_s10 }
  0x10   : > { %s5645_s12 = scalar_lea.hbm %s5889_s8, 27648  ;;  %p6599_p7 = pneg %p5881_p5 }
  0x11   : > { %p5646_p6 = scmp.ne.s32.totalorder %s5889_s8, %s5645_s12  ;;  %p5651_p10 = scmp.lt.u32.totalorder %s5889_s8, %s6593_s1 }
  0x12   : > { %p5652_p11 = scmp.lt.u32.totalorder %s5650_s15, %s5645_s12  ;;  %p5654_p13 = scmp.lt.u32.totalorder %s5645_s12, %s5889_s8 }
  0x13   : > { %p5648_p8 = pnand %p6599_p7, %p5646_p6 }
  0x14   : > { %p5653_p12 = por %p5652_p11, %p5651_p10 }
  0x15   : > { %p5649_p9 = pneg %p5648_p8 }
  0x16   : > { %p5655_p0 = por %p5654_p13, %p5653_p12 }
  0x18   : > { %p5656_p1 = pnand %p5655_p0, %p5649_p9 }
  0x1a   : > { %5659 = shalt.err (!%p5656_p1)
}
  0x1b   : > { %s5660_s23 = scalar_lea.vmem %s5892_s10, 27648  ;;  %s5803_s24 = smov [#allocation6]  }
  0x1c   : > { %p5661_p2 = scmp.ne.s32.totalorder %s5892_s10, %s5660_s23  ;;  %s5665_s26 = sshll.u32 %s5803_s24, 4  ;;  %s5666_s26 = int_to_ptr.vmem [resolvable:$false] %s5665_s26 }
  0x1d   : > { %s5667_s27 = scalar_lea.vmem %s5666_s26, 55296  ;;  %p5668_p6 = scmp.lt.s32.totalorder %s5892_s10, %s5666_s26 }
  0x1e   : > { %p5663_p3 = pnand %p5661_p2, %p6599_p7  ;;  %p5669_p8 = scmp.lt.s32.totalorder %s5667_s27, %s5660_s23 }
  0x20   : > { %p5664_p4 = pneg %p5663_p3  ;;  %p5670_p10 = por %p5669_p8, %p5668_p6 }
  0x22   : > { %p5671_p11 = pnand %p5670_p10, %p5664_p4 }
  0x24   : > { %5674 = shalt.err (!%p5671_p11)
}
  0x25   : > { %s5804_s30 = smov 576   ;;  %s5805_s6 = smov 192  }
  0x26   : > { %s5806_s7 = smov 12   ;;  %s5924_s9 = sadd.s32 4294967295, %s5801_s21  }
  0x27   : > { %4994 = dma.hbm_to_vmem [thread:$0]  (!%p5881_p5), %s5889_s8, 27648, %s5892_s10, %s5894_s11, %s5804_s30, %s5805_s6, %s5806_s7  }
  0x28   : > { %p6598_p9 = scmp.eq.s32.totalorder %s5924_s9, 0  ;;  %p61_p12 = scmp.ne.s32.totalorder %s5793_s19, %s5789_s18 }
  0x29   : > { %p3347_p13 = scmp.ge.s32.totalorder %s5801_s21, 1  ;;  %p166_p0 = scmp.lt.s32.totalorder %s5801_s21, 4 }
  0x2a   : > { %p5934_p2 = por %p6598_p9, %p61_p12  ;;  %s5807_s8 = smov [#allocation3]  }
  0x2b   : > { %p5938_p3 = pnand %p3347_p13, %p166_p0  ;;  %s179_s10 = sshll.u32 %s5807_s8, 4  ;;  %s180_s10 = int_to_ptr.vmem [resolvable:$true] %s179_s10 }
  0x2c   : > { %s6605_s12 = scalar_select %p5934_p2, 1, 0 }
  0x2d   : > { %s6606_s13 = scalar_select %p5938_p3, 1, 0 }
  0x2e   : > { %p4987_p4 = pneg %p5938_p3  ;;  %s5000_s14 = smul.u32 27648, %s5801_s21 }
  0x2f   : > { %s226_s18 = scalar_lea.vmem [#allocation8], %s5879_s28  ;;  %s5675_s21 = scalar_lea.hbm %s6592_s0, 1152 }
  0x30   : > { %s234_s15 = sshll.u32 %s226_s18, 4  ;;  %p5948_p6 = pnand %p4987_p4, %p6598_p9  ;;  %s5957_s15 = int_to_ptr.vmem [resolvable:$true] %s234_s15 }
  0x31   : > { %s5955_s24 = scalar_lea.hbm %s6595_s3, %s5000_s14  ;;  %p5676_p8 = scmp.ne.s32.totalorder %s6592_s0, %s5675_s21 }
  0x32   : > { %p5677_p10 = pneg %p5948_p6  ;;  %p5682_p13 = scmp.lt.u32.totalorder %s5675_s21, %s6592_s0 }
  0x34   : > { %p5678_p11 = pnand %p5677_p10, %p5676_p8 }
  0x36   : > { %p5679_p12 = pneg %p5678_p11 }
  0x38   : > { %p5684_p0 = pnand %p5682_p13, %p5679_p12 }
  0x3a   : > { %5687 = shalt.err (!%p5684_p0)
}
  0x3b   : > { %s5688_s14 = scalar_lea.vmem %s180_s10, 1152  ;;  %p5696_p7 = scmp.lt.s32.totalorder %s180_s10, %s180_s10 }
  0x3c   : > { %p5689_p4 = scmp.ne.s32.totalorder %s180_s10, %s5688_s14  ;;  %p5697_p2 = scmp.lt.s32.totalorder %s5688_s14, %s5688_s14 }
  0x3e   : > { %p5691_p1 = pnand %p5689_p4, %p5677_p10  ;;  %p5698_p3 = por %p5697_p2, %p5696_p7 }
  0x40   : > { %p5692_p9 = pneg %p5691_p1 }
  0x42   : > { %p5699_p5 = pnand %p5698_p3, %p5692_p9 }
  0x44   : > { %5702 = shalt.err (!%p5699_p5)
}
  0x45   : > { %4990 = dma.hbm_to_vmem [thread:$0]  (!%p5948_p6), %s6592_s0, 1152, %s180_s10, [#allocation4]  }
  0x46   : > { %s5703_s23 = scalar_lea.hbm %s5955_s24, 27648  ;;  %p6608_p10 = scmp.ne.s32.totalorder %s6604_s29, 0 }
  0x47   : > { %p5704_p8 = scmp.ne.s32.totalorder %s5955_s24, %s5703_s23  ;;  %s5708_s21 = scalar_lea.hbm %s6595_s3, 82944 }
  0x48   : > { %p6609_p1 = pneg %p6608_p10  ;;  %p5709_p5 = scmp.lt.u32.totalorder %s5955_s24, %s6595_s3 }
  0x49   : > { %p5710_p7 = scmp.lt.u32.totalorder %s5708_s21, %s5703_s23  ;;  %p5712_p2 = scmp.lt.u32.totalorder %s5703_s23, %s5955_s24 }
  0x4a   : > { %p5706_p11 = pnand %p5704_p8, %p6609_p1 }
  0x4b   : > { %p5711_p9 = por %p5710_p7, %p5709_p5 }
  0x4c   : > { %p5707_p12 = pneg %p5706_p11 }
  0x4d   : > { %p5713_p3 = por %p5712_p2, %p5711_p9 }
  0x4f   : > { %p5714_p13 = pnand %p5713_p3, %p5707_p12 }
  0x51   : > { %5717 = shalt.err (!%p5714_p13)
}
  0x52   : > { %s5718_s10 = scalar_lea.vmem %s5957_s15, 27648  ;;  %p6610_p0 = pmov %p6609_p1 }
  0x53   : > { %p5719_p6 = scmp.ne.s32.totalorder %s5957_s15, %s5718_s10  ;;  %s5808_s28 = smov [#allocation8]  }
  0x54   : > { %s5723_s7 = sshll.u32 %s5808_s28, 4  ;;  %s5724_s7 = int_to_ptr.vmem [resolvable:$false] %s5723_s7 }
  0x55   : > { %p5721_p4 = pnand %p5719_p6, %p6610_p0  ;;  %s5725_s8 = scalar_lea.vmem %s5724_s7, 55296 }
  0x56   : > { %p5726_p1 = scmp.lt.s32.totalorder %s5957_s15, %s5724_s7  ;;  %p5727_p11 = scmp.lt.s32.totalorder %s5725_s8, %s5718_s10 }
  0x57   : > { %p5722_p8 = pneg %p5721_p4 }
  0x58   : > { %p5728_p5 = por %p5727_p11, %p5726_p1 }
  0x5a   : > { %p5729_p7 = pnand %p5728_p5, %p5722_p8 }
  0x5c   : > { %5732 = shalt.err (!%p5729_p7)
}
  0x5d   : > { %s5809_s14 = smov 36   ;;  %p6611_p12 = scmp.ne.s32.totalorder %s6606_s13, 0 }
  0x5e   : > { %4997 = dma.hbm_to_vmem [thread:$0]  (!%p6608_p10), %s5955_s24, 27648, %s5957_s15, %s5894_s11, %s5804_s30, %s5804_s30, %s5809_s14  }
  0x5f   : > { %246 = sbr.rel (%p6611_p12) target bundleno = 1102 (0x44e), region = 40  ;;  %p6612_p9 = scmp.eq.s32.totalorder (!%p6611_p12), %s5924_s9, 0 }
  0x66   : > { %5776 = dma.done.wait (%p6612_p9), [#allocation4], 1152   ;;  %p6613_p2 = pmov %p6612_p9 }
  0x67   : > { %s252_s18 = sand.u32 1, %s5924_s9   ;;  %s254_s29 = sand.u32 1, %s5793_s19  }
  0x68   : > { %5778 = vsyncadd (%p6613_p2), [#allocation4], 4294966144  ;;  %s4974_s17 = smul.u32 1728, %s254_s29  ;;  %s253_s23 = scalar_lea.sflag [#allocation7], %s252_s18 }
  0x69   : > { %p6614_p3 = scmp.ne.s32.totalorder %s6605_s12, 0 }
  0x6a   : > { %s6009_s26 = scalar_lea.vmem [#allocation6], %s4974_s17 }
  0x6b   : > { %5780 = dma.done.wait (%p6614_p3), %s253_s23, 55296  }
  0x6c   : > { %5782 = vsyncadd (%p6614_p3), %s253_s23, 4294912000  ;;  %s297_s11 = smul.u32 3, %s5924_s9  ;;  %s6022_s24 = scalar_lea.vmem [#allocation8], %s4974_s17 }
  0x6d   : > { %p6615_p13 = scmp.ne.s32.totalorder %s5924_s9, 0 }
  0x6e   : > { %p298_p10 = scmp.lt.s32.totalorder %s297_s11, 8  ;;  %v311_v0 = vlaneseq (!%p6615_p13)  ;;  %v3355_v1 = vld [vmem:[%s6596_s4 + $0x8] ss:$0 sm:$0xff] (!%p6615_p13)  ;;  %v307_v3 = vld [vmem:[%s6596_s4] sm:$0xff] (!%p6615_p13) }
  0x6f   : > { %306 = sbr.rel (%p6615_p13) target bundleno = 122 (0x7a), region = 56  ;;  %364 = vst [vmem:[#allocation2 + $0x40] sm:$0xff] (!%p6615_p13), %v3355_v1 }
  0x70   : > { %s6621_s11 = smov (!%p298_p10, %s297_s11), 8  ;;  %v312_v2 = vshrl.u32 (!%p6615_p13), %v311_v0, 7 }
  0x71   : > { %s300_s15 = scalar_lea.vmem %s6594_s2, %s6621_s11 }
  0x72   : > { %v313_v4 = vsub.s32 (!%p6615_p13), 0, %v312_v2  ;;  %v317_v5 = vsub.s32 (!%p6615_p13), 1, %v312_v2  ;;  %v321_v6 = vsub.s32 (!%p6615_p13), 2, %v312_v2  ;;  %v325_v7 = vsub.s32 (!%p6615_p13), 3, %v312_v2 }
  0x73   : > { %v329_v8 = vsub.s32 (!%p6615_p13), 4, %v312_v2  ;;  %v333_v9 = vsub.s32 (!%p6615_p13), 5, %v312_v2  ;;  %v337_v10 = vsub.s32 (!%p6615_p13), 6, %v312_v2  ;;  %v341_v11 = vsub.s32 (!%p6615_p13), 7, %v312_v2 }
  0x74   : > { %v314_v12 = vrot.slane (!%p6615_p13), %v307_v3, %v313_v4  ;;  %v318_v13 = vrot.slane (!%p6615_p13), %v307_v3, %v317_v5  ;;  %v322_v14 = vrot.slane (!%p6615_p13), %v307_v3, %v321_v6  ;;  %v326_v15 = vrot.slane (!%p6615_p13), %v307_v3, %v325_v7 }
  0x75   : > { %v330_v16 = vrot.slane (!%p6615_p13), %v307_v3, %v329_v8  ;;  %v334_v17 = vrot.slane (!%p6615_p13), %v307_v3, %v333_v9  ;;  %v338_v18 = vrot.slane (!%p6615_p13), %v307_v3, %v337_v10  ;;  %v342_v19 = vrot.slane (!%p6615_p13), %v307_v3, %v341_v11 }
  0x76   : > { %356 = vst [vmem:[#allocation2] sm:$0xff] %v314_v12  ;;  %357 = vst [vmem:[#allocation2 + $0x8] sm:$0xff] %v318_v13 }
  0x77   : > { %358 = vst [vmem:[#allocation2 + $0x10] sm:$0xff] %v322_v14  ;;  %359 = vst [vmem:[#allocation2 + $0x18] sm:$0xff] %v326_v15 }
  0x78   : > { %360 = vst [vmem:[#allocation2 + $0x20] sm:$0xff] %v330_v16  ;;  %361 = vst [vmem:[#allocation2 + $0x28] sm:$0xff] %v334_v17 }
  0x79   : > { %362 = vst [vmem:[#allocation2 + $0x30] sm:$0xff] %v338_v18  ;;  %363 = vst [vmem:[#allocation2 + $0x38] sm:$0xff] %v342_v19 }
  0x7a PF: > { %v5045_v20 = vld [vmem:[%s6009_s26 + $0x4] ss:$12 sps:$4 sm:$0xff]   ;;  %v5047_v21 = vld [vmem:[%s6009_s26] ss:$12 sps:$4 sm:$0xff]   ;;  %v5048_v22 = vld [vmem:[%s6009_s26 + $0x1c] ss:$12 sps:$4 sm:$0xff]  }
  0x7b   : > { %3642 = vmatprep.subr.bf16.mxu0 %v5045_v20  ;;  %v5050_v23 = vld [vmem:[%s6009_s26 + $0x18] ss:$12 sps:$4 sm:$0xff]   ;;  %v5051_v24 = vld [vmem:[%s6009_s26 + $0x34] ss:$12 sps:$4 sm:$0xff]   ;;  %v5053_v25 = vld [vmem:[%s6009_s26 + $0x30] ss:$12 sps:$4 sm:$0xff]  }
  0x7c   : > { %3644 = vmatpush1.bf16.msra.mxu0 %v5047_v21  ;;  %v5054_v26 = vld [vmem:[%s6009_s26 + $0x4c] ss:$12 sps:$4 sm:$0xff]   ;;  %v5056_v27 = vld [vmem:[%s6009_s26 + $0x48] ss:$12 sps:$4 sm:$0xff]   ;;  %v5057_v28 = vld [vmem:[%s6009_s26 + $0x64] ss:$12 sps:$4 sm:$0xff]  }
  0x7d   : > { %3646 = vmatprep.subr.bf16.mxu0 %v5048_v22  ;;  %v5059_v29 = vld [vmem:[%s6009_s26 + $0x60] ss:$12 sps:$4 sm:$0xff]   ;;  %v5060_v30 = vld [vmem:[%s6009_s26 + $0x7c] ss:$12 sps:$4 sm:$0xff]   ;;  %v5062_v33 = vld [vmem:[%s6009_s26 + $0x78] ss:$12 sps:$4 sm:$0xff]  }
  0x7e   : > { %v5081_v31 = vld [vmem:[%s6009_s26 + $0xc8] ss:$12 sps:$4 sm:$0xff]   ;;  %v5086_v35 = vld [vmem:[%s6009_s26 + $0xe0] ss:$12 sps:$4 sm:$0xff]   ;;  %v5065_v37 = vld [vmem:[%s6009_s26 + $0x90] ss:$12 sps:$4 sm:$0xff]  }
  0x7f   : > { %v5082_v32 = vld [vmem:[%s6009_s26 + $0x8] ss:$12 sps:$4 sm:$0xff]   ;;  %3930 = vmatprep.subr.bf16.mxu1 %v5081_v31  ;;  %v5087_v36 = vld [vmem:[%s6009_s26 + $0x20] ss:$12 sps:$4 sm:$0xff]   ;;  %v5091_v39 = vld [vmem:[%s6009_s26 + $0xf8] ss:$12 sps:$4 sm:$0xff]  }
  0x80   : > { %3648 = vmatpush1.bf16.msra.mxu0 %v5050_v23  ;;  %v5063_v34 = vld [vmem:[%s6009_s26 + $0x94] ss:$12 sps:$4 sm:$0xff]   ;;  %3932 = vmatpush3.bf16.msra.mxu1 %v5082_v32  ;;  %v5066_v38 = vld [vmem:[%s6009_s26 + $0xac] ss:$12 sps:$4 sm:$0xff]   ;;  %v5096_v42 = vld [vmem:[%s6009_s26 + $0x110] ss:$12 sps:$4 sm:$0xff]  }
  0x81   : > { %3650 = vmatprep.subr.bf16.mxu0 %v5051_v24  ;;  %3934 = vmatprep.subr.bf16.mxu1 %v5086_v35  ;;  %v5092_v40 = vld [vmem:[%s6009_s26 + $0x38] ss:$12 sps:$4 sm:$0xff]   ;;  %v5068_v41 = vld [vmem:[%s6009_s26 + $0xa8] ss:$12 sps:$4 sm:$0xff]   ;;  %v5097_v43 = vld [vmem:[%s6009_s26 + $0x50] ss:$12 sps:$4 sm:$0xff]  }
  0x82   : > { %v5069_v44 = vld [vmem:[%s6009_s26 + $0xc4] ss:$12 sps:$4 sm:$0xff]   ;;  %v5071_v45 = vld [vmem:[%s6009_s26 + $0xc0] ss:$12 sps:$4 sm:$0xff]   ;;  %v5101_v46 = vld [vmem:[%s6009_s26 + $0x128] ss:$12 sps:$4 sm:$0xff]  }
  0x83   : > { %v5102_v47 = vld [vmem:[%s6009_s26 + $0x68] ss:$12 sps:$4 sm:$0xff]   ;;  %v1758_v48 = vld [vmem:[#allocation3 + $0x8] sm:$0xff]  ;;  %v5077_v55 = vld [vmem:[%s6009_s26 + $0xf0] ss:$12 sps:$4 sm:$0xff]   ;;  %vm5811_vm0 = vmmov 0  }
  0x84   : > { %3652 = vmatpush1.bf16.msra.mxu0 %v5053_v25  ;;  %3936 = vmatpush3.bf16.msra.mxu1 %v5087_v36  ;;  %v5072_v49 = vld [vmem:[%s6009_s26 + $0xdc] ss:$12 sps:$4 sm:$0xff]   ;;  %v5074_v50 = vld [vmem:[%s6009_s26 + $0xd8] ss:$12 sps:$4 sm:$0xff]   ;;  %v5106_v51 = vld [vmem:[%s6009_s26 + $0x140] ss:$12 sps:$4 sm:$0xff]  }
  0x85   : > { %3654 = vmatprep.subr.bf16.mxu0 %v5054_v26  ;;  %3938 = vmatprep.subr.bf16.mxu1 %v5091_v39  ;;  %v5107_v52 = vld [vmem:[%s6009_s26 + $0x80] ss:$12 sps:$4 sm:$0xff]   ;;  %v5111_v54 = vld [vmem:[%s6009_s26 + $0x158] ss:$12 sps:$4 sm:$0xff]   ;;  %v5116_v58 = vld [vmem:[%s6009_s26 + $0x170] ss:$12 sps:$4 sm:$0xff]  }
  0x86   : > { %1847 = vmatprep.mubr.f32.mxu0 %v1758_v48  ;;  %2202 = vmatprep.mubr.f32.mxu1 %v1758_v48  ;;  %v5075_v53 = vld [vmem:[%s6009_s26 + $0xf4] ss:$12 sps:$4 sm:$0xff]   ;;  %v5078_v56 = vld [vmem:[%s6009_s26 + $0x10c] ss:$12 sps:$4 sm:$0xff]   ;;  %v5083_v60 = vld [vmem:[%s6009_s26 + $0x124] ss:$12 sps:$4 sm:$0xff]  }
  0x87   : > { %v5112_v57 = vld [vmem:[%s6009_s26 + $0x98] ss:$12 sps:$4 sm:$0xff]   ;;  %v5080_v59 = vld [vmem:[%s6009_s26 + $0x108] ss:$12 sps:$4 sm:$0xff]   ;;  %v5117_v61 = vld [vmem:[%s6009_s26 + $0xb0] ss:$12 sps:$4 sm:$0xff]  }
  0x88   : > { %3656 = vmatpush1.bf16.msra.mxu0 %v5056_v27  ;;  %3940 = vmatpush3.bf16.msra.mxu1 %v5092_v40  ;;  %v5121_v62 = vld [vmem:[%s6009_s26 + $0x248] ss:$12 sps:$4 sm:$0xff]   ;;  %v5085_v63 = vld [vmem:[%s6009_s26 + $0x120] ss:$12 sps:$4 sm:$0xff]   ;;  %v5090_v3 = vld [vmem:[%s6009_s26 + $0x138] ss:$12 sps:$4 sm:$0xff]  }
  0x89   : > { %3658 = vmatprep.subr.bf16.mxu0 %v5057_v28  ;;  %3942 = vmatprep.subr.bf16.mxu1 %v5096_v42  ;;  %v5088_v0 = vld [vmem:[%s6009_s26 + $0x13c] ss:$12 sps:$4 sm:$0xff]   ;;  %v5126_v2 = vld [vmem:[%s6009_s26 + $0x260] ss:$12 sps:$4 sm:$0xff]   ;;  %v5131_v7 = vld [vmem:[%s6009_s26 + $0x278] ss:$12 sps:$4 sm:$0xff]  }
  0x8a   : > { %v5122_v1 = vld [vmem:[%s6009_s26 + $0x188] ss:$12 sps:$4 sm:$0xff]   ;;  %v1757_v4 = vld [vmem:[#allocation3] sm:$0xff]  ;;  %v5127_v6 = vld [vmem:[%s6009_s26 + $0x1a0] ss:$12 sps:$4 sm:$0xff]   ;;  %p3356_p6 = scmp.ne.s32.totalorder %s5924_s9, 2 }
  0x8b   : > { %v5093_v5 = vld [vmem:[%s6009_s26 + $0x154] ss:$12 sps:$4 sm:$0xff]   ;;  %v5095_v8 = vld [vmem:[%s6009_s26 + $0x150] ss:$12 sps:$4 sm:$0xff]   ;;  %v5132_v9 = vld [vmem:[%s6009_s26 + $0x1b8] ss:$12 sps:$4 sm:$0xff]  }
  0x8c   : > { %3660 = vmatpush1.bf16.msra.mxu0 %v5059_v29  ;;  %3944 = vmatpush3.bf16.msra.mxu1 %v5097_v43  ;;  %v5098_v10 = vld [vmem:[%s6009_s26 + $0x16c] ss:$12 sps:$4 sm:$0xff]   ;;  %v5136_v11 = vld [vmem:[%s6009_s26 + $0x290] ss:$12 sps:$4 sm:$0xff]   ;;  %v5100_v12 = vld [vmem:[%s6009_s26 + $0x168] ss:$12 sps:$4 sm:$0xff]  }
  0x8d   : > { %3662 = vmatprep.subr.bf16.mxu0 %v5060_v30  ;;  %3946 = vmatprep.subr.bf16.mxu1 %v5101_v46  ;;  %v5103_v13 = vld [vmem:[%s6009_s26 + $0x184] ss:$12 sps:$4 sm:$0xff]   ;;  %v5141_v15 = vld [vmem:[%s6009_s26 + $0x2a8] ss:$12 sps:$4 sm:$0xff]   ;;  %v5105_v16 = vld [vmem:[%s6009_s26 + $0x180] ss:$12 sps:$4 sm:$0xff]  }
  0x8e   : > { %v5137_v14 = vld [vmem:[%s6009_s26 + $0x1d0] ss:$12 sps:$4 sm:$0xff]   ;;  %v5142_v18 = vld [vmem:[%s6009_s26 + $0x1e8] ss:$12 sps:$4 sm:$0xff]   ;;  %v5146_v19 = vld [vmem:[%s6009_s26 + $0x2c0] ss:$12 sps:$4 sm:$0xff]  }
  0x8f   : > { %v5108_v17 = vld [vmem:[%s6009_s26 + $0x19c] ss:$12 sps:$4 sm:$0xff]   ;;  %v5110_v20 = vld [vmem:[%s6009_s26 + $0x198] ss:$12 sps:$4 sm:$0xff]   ;;  %v5113_v21 = vld [vmem:[%s6009_s26 + $0x1b4] ss:$12 sps:$4 sm:$0xff]  }
  0x90   : > { %3664 = vmatpush1.bf16.msra.mxu0 %v5062_v33  ;;  %3948 = vmatpush3.bf16.msra.mxu1 %v5102_v47  ;;  %v5147_v22 = vld [vmem:[%s6009_s26 + $0x200] ss:$12 sps:$4 sm:$0xff]   ;;  %v5151_v23 = vld [vmem:[%s6009_s26 + $0x2d8] ss:$12 sps:$4 sm:$0xff]   ;;  %v5115_v24 = vld [vmem:[%s6009_s26 + $0x1b0] ss:$12 sps:$4 sm:$0xff]  }
  0x91   : > { %3666 = vmatprep.subr.bf16.mxu0 %v5063_v34  ;;  %3950 = vmatprep.subr.bf16.mxu1 %v5106_v51  ;;  %v1760_v25 = vld [vmem:[#allocation3 + $0x18] sm:$0xff]  ;;  %v5118_v26 = vld [vmem:[%s6009_s26 + $0x1cc] ss:$12 sps:$4 sm:$0xff]   ;;  %v5128_v36 = vld [vmem:[%s6009_s26 + $0x1fc] ss:$12 sps:$4 sm:$0xff]  }
  0x92   : > { %v5152_v27 = vld [vmem:[%s6009_s26 + $0x218] ss:$12 sps:$4 sm:$0xff]   ;;  %v5156_v28 = vld [vmem:[%s6009_s26 + $0x2f0] ss:$12 sps:$4 sm:$0xff]   ;;  %v5120_v29 = vld [vmem:[%s6009_s26 + $0x1c8] ss:$12 sps:$4 sm:$0xff]  }
  0x93   : > { %v5123_v30 = vld [vmem:[%s6009_s26 + $0x1e4] ss:$12 sps:$4 sm:$0xff]   ;;  %v5161_v32 = vld [vmem:[%s6009_s26 + $0x3c8] ss:$12 sps:$4 sm:$0xff]   ;;  %v5125_v33 = vld [vmem:[%s6009_s26 + $0x1e0] ss:$12 sps:$4 sm:$0xff]  }
  0x94   : > { %3668 = vmatpush1.bf16.msra.mxu0 %v5065_v37  ;;  %3952 = vmatpush3.bf16.msra.mxu1 %v5107_v52  ;;  %v5157_v31 = vld [vmem:[%s6009_s26 + $0x230] ss:$12 sps:$4 sm:$0xff]   ;;  %v6107_v34 = vld [vmem:[#allocation3 + $0x10] sm:$0xff]  ;;  %v5133_v39 = vld [vmem:[%s6009_s26 + $0x214] ss:$12 sps:$4 sm:$0xff]  }
  0x95   : > { %3670 = vmatprep.subr.bf16.mxu0 %v5066_v38  ;;  %3954 = vmatprep.subr.bf16.mxu1 %v5111_v54  ;;  %v5162_v35 = vld [vmem:[%s6009_s26 + $0x308] ss:$12 sps:$4 sm:$0xff]   ;;  %v5166_v37 = vld [vmem:[%s6009_s26 + $0x3e0] ss:$12 sps:$4 sm:$0xff]   ;;  %v5130_v38 = vld [vmem:[%s6009_s26 + $0x1f8] ss:$12 sps:$4 sm:$0xff]  }
  0x96   : > { %v5167_v40 = vld [vmem:[%s6009_s26 + $0x320] ss:$12 sps:$4 sm:$0xff]   ;;  %v5135_v42 = vld [vmem:[%s6009_s26 + $0x210] ss:$12 sps:$4 sm:$0xff]   ;;  %v5140_v46 = vld [vmem:[%s6009_s26 + $0x228] ss:$12 sps:$4 sm:$0xff]  }
  0x97   : > { %v5138_v43 = vld [vmem:[%s6009_s26 + $0x22c] ss:$12 sps:$4 sm:$0xff]   ;;  %v5143_v47 = vld [vmem:[%s6009_s26 + $0x244] ss:$12 sps:$4 sm:$0xff]   ;;  %v5148_v51 = vld [vmem:[%s6009_s26 + $0x25c] ss:$12 sps:$4 sm:$0xff]  }
  0x98   : > { %3672 = vmatpush1.bf16.msra.mxu0 %v5068_v41  ;;  %3956 = vmatpush3.bf16.msra.mxu1 %v5112_v57  ;;  %v5171_v41 = vld [vmem:[%s6009_s26 + $0x3f8] ss:$12 sps:$4 sm:$0xff]   ;;  %v5177_v48 = vld [vmem:[%s6009_s26 + $0x350] ss:$12 sps:$4 sm:$0xff]   ;;  %v5182_v52 = vld [vmem:[%s6009_s26 + $0x368] ss:$12 sps:$4 sm:$0xff]  }
  0x99   : > { %3674 = vmatprep.subr.bf16.mxu0 %v5069_v44  ;;  %3958 = vmatprep.subr.bf16.mxu1 %v5116_v58  ;;  %v5172_v44 = vld [vmem:[%s6009_s26 + $0x338] ss:$12 sps:$4 sm:$0xff]   ;;  %v5187_v57 = vld [vmem:[%s6009_s26 + $0x380] ss:$12 sps:$4 sm:$0xff]  }
  0x9a   : > { %v6129_v54 = vld [vmem:[#allocation3 + $0x28] sm:$0xff] }
  0x9b   : > { %v5191_v58 = vld [vmem:[%s6009_s26 + $0x458] ss:$12 sps:$4 sm:$0xff]  }
  0x9c   : > { %3676 = vmatpush1.bf16.msra.mxu0 %v5071_v45  ;;  %3960 = vmatpush3.bf16.msra.mxu1 %v5117_v61  ;;  %v5176_v45 = vld [vmem:[%s6009_s26 + $0x410] ss:$12 sps:$4 sm:$0xff]   ;;  %v5158_v61 = vld [vmem:[%s6009_s26 + $0x28c] ss:$12 sps:$4 sm:$0xff]  }
  0x9d   : > { %3678 = vmatprep.subr.bf16.mxu0 %v5072_v49  ;;  %3962 = vmatprep.subr.bf16.mxu1 %v5121_v62  ;;  %v5181_v49 = vld [vmem:[%s6009_s26 + $0x428] ss:$12 sps:$4 sm:$0xff]   ;;  %v5196_v62 = vld [vmem:[%s6009_s26 + $0x470] ss:$12 sps:$4 sm:$0xff]  }
  0x9f   : > { %2203 = vmatmul.mubr.f32.vlgmr.msra.gmra.mrb[0].mxu1 %v1757_v4 }
  0xa0   : > { %3680 = vmatpush1.bf16.msra.mxu0 %v5074_v50  ;;  %3964 = vmatpush3.bf16.msra.mxu1 %v5122_v1  ;;  %v5145_v50 = vld [vmem:[%s6009_s26 + $0x240] ss:$12 sps:$4 sm:$0xff]   ;;  %v5197_v1 = vld [vmem:[%s6009_s26 + $0x3b0] ss:$12 sps:$4 sm:$0xff]  }
  0xa1   : > { %3682 = vmatprep.subr.bf16.mxu0 %v5075_v53  ;;  %3966 = vmatprep.subr.bf16.mxu1 %v5126_v2  ;;  %v5186_v53 = vld [vmem:[%s6009_s26 + $0x440] ss:$12 sps:$4 sm:$0xff]   ;;  %v5201_v2 = vld [vmem:[%s6009_s26 + $0x548] ss:$12 sps:$4 sm:$0xff]  }
  0xa2   : > { %2272 = vmatprep.mubr.f32.mxu1 %v1760_v25 }
  0xa4   : > { %3684 = vmatpush1.bf16.msra.mxu0 %v5077_v55  ;;  %3968 = vmatpush3.bf16.msra.mxu1 %v5127_v6  ;;  %v5150_v55 = vld [vmem:[%s6009_s26 + $0x258] ss:$12 sps:$4 sm:$0xff]   ;;  %v5202_v6 = vld [vmem:[%s6009_s26 + $0x488] ss:$12 sps:$4 sm:$0xff]  }
  0xa5   : > { %3686 = vmatprep.subr.bf16.mxu0 %v5078_v56  ;;  %3970 = vmatprep.subr.bf16.mxu1 %v5131_v7  ;;  %v5153_v56 = vld [vmem:[%s6009_s26 + $0x274] ss:$12 sps:$4 sm:$0xff]  }
  0xa6   : > { %v5206_v7 = vld [vmem:[%s6009_s26 + $0x560] ss:$12 sps:$4 sm:$0xff]  }
  0xa8   : > { %3688 = vmatpush1.bf16.msra.mxu0 %v5080_v59  ;;  %3972 = vmatpush3.bf16.msra.mxu1 %v5132_v9  ;;  %v5155_v59 = vld [vmem:[%s6009_s26 + $0x270] ss:$12 sps:$4 sm:$0xff]   ;;  %v5173_v9 = vld [vmem:[%s6009_s26 + $0x2d4] ss:$12 sps:$4 sm:$0xff]  }
  0xa9   : > { %3690 = vmatprep.subr.bf16.mxu0 %v5083_v60  ;;  %3974 = vmatprep.subr.bf16.mxu1 %v5136_v11  ;;  %v5192_v60 = vld [vmem:[%s6009_s26 + $0x398] ss:$12 sps:$4 sm:$0xff]  }
  0xaa   : > { %v5211_v11 = vld [vmem:[%s6009_s26 + $0x578] ss:$12 sps:$4 sm:$0xff]  }
  0xac   : > { %3692 = vmatpush1.bf16.msra.mxu0 %v5085_v63  ;;  %3976 = vmatpush3.bf16.msra.mxu1 %v5137_v14  ;;  %v5160_v63 = vld [vmem:[%s6009_s26 + $0x288] ss:$12 sps:$4 sm:$0xff]   ;;  %v5212_v14 = vld [vmem:[%s6009_s26 + $0x4b8] ss:$12 sps:$4 sm:$0xff]  }
  0xad   : > { %3694 = vmatprep.subr.bf16.mxu0 %v5088_v0  ;;  %3978 = vmatprep.subr.bf16.mxu1 %v5141_v15  ;;  %v5163_v0 = vld [vmem:[%s6009_s26 + $0x2a4] ss:$12 sps:$4 sm:$0xff]  }
  0xae   : > { %v5216_v15 = vld [vmem:[%s6009_s26 + $0x590] ss:$12 sps:$4 sm:$0xff]  }
  0xb0   : > { %3696 = vmatpush1.bf16.msra.mxu0 %v5090_v3  ;;  %3980 = vmatpush3.bf16.msra.mxu1 %v5142_v18  ;;  %v5165_v3 = vld [vmem:[%s6009_s26 + $0x2a0] ss:$12 sps:$4 sm:$0xff]   ;;  %v5183_v18 = vld [vmem:[%s6009_s26 + $0x304] ss:$12 sps:$4 sm:$0xff]  }
  0xb1   : > { %3698 = vmatprep.subr.bf16.mxu0 %v5093_v5  ;;  %3982 = vmatprep.subr.bf16.mxu1 %v5146_v19  ;;  %v6146_v5 = vld [vmem:[#allocation3 + $0x20] sm:$0xff]  ;;  %v5221_v19 = vld [vmem:[%s6009_s26 + $0x5a8] ss:$12 sps:$4 sm:$0xff]  }
  0xb4   : > { %3700 = vmatpush1.bf16.msra.mxu0 %v5095_v8  ;;  %3984 = vmatpush3.bf16.msra.mxu1 %v5147_v22  ;;  %v5170_v8 = vld [vmem:[%s6009_s26 + $0x2b8] ss:$12 sps:$4 sm:$0xff]   ;;  %v5188_v22 = vld [vmem:[%s6009_s26 + $0x31c] ss:$12 sps:$4 sm:$0xff]  }
  0xb5   : > { %3702 = vmatprep.subr.bf16.mxu0 %v5098_v10  ;;  %3986 = vmatprep.subr.bf16.mxu1 %v5151_v23  ;;  %v5207_v10 = vld [vmem:[%s6009_s26 + $0x4a0] ss:$12 sps:$4 sm:$0xff]   ;;  %v5222_v23 = vld [vmem:[%s6009_s26 + $0x4e8] ss:$12 sps:$4 sm:$0xff]  }
  0xb8   : > { %3704 = vmatpush1.bf16.msra.mxu0 %v5100_v12  ;;  %3988 = vmatpush3.bf16.msra.mxu1 %v5152_v27  ;;  %v5175_v12 = vld [vmem:[%s6009_s26 + $0x2d0] ss:$12 sps:$4 sm:$0xff]   ;;  %v5227_v27 = vld [vmem:[%s6009_s26 + $0x500] ss:$12 sps:$4 sm:$0xff]  }
  0xb9   : > { %3706 = vmatprep.subr.bf16.mxu0 %v5103_v13  ;;  %3990 = vmatprep.subr.bf16.mxu1 %v5156_v28  ;;  %v5178_v13 = vld [vmem:[%s6009_s26 + $0x2ec] ss:$12 sps:$4 sm:$0xff]  }
  0xba   : > { %v5231_v28 = vld [vmem:[%s6009_s26 + $0x5d8] ss:$12 sps:$4 sm:$0xff]  }
  0xbb   : > { %1848 = vmatmul.mubr.f32.vlgmr.msra.gmra.mrb[0].mxu0 %v1757_v4  ;;  %v5168_v4 = vld [vmem:[%s6009_s26 + $0x2bc] ss:$12 sps:$4 sm:$0xff]  }
  0xbc   : > { %3708 = vmatpush1.bf16.msra.mxu0 %v5105_v16  ;;  %1918 = vmatprep.mubr.f32.mxu0 %v1760_v25  ;;  %v5180_v16 = vld [vmem:[%s6009_s26 + $0x2e8] ss:$12 sps:$4 sm:$0xff]   ;;  %v5190_v25 = vld [vmem:[%s6009_s26 + $0x318] ss:$12 sps:$4 sm:$0xff]  }
  0xbd   : > { %3710 = vmatprep.subr.bf16.mxu0 %v5108_v17  ;;  %3992 = vmatpush3.bf16.msra.mxu1 %v5157_v31  ;;  %v5217_v17 = vld [vmem:[%s6009_s26 + $0x4d0] ss:$12 sps:$4 sm:$0xff]   ;;  %v5198_v31 = vld [vmem:[%s6009_s26 + $0x34c] ss:$12 sps:$4 sm:$0xff]  }
  0xbe   : > { %3994 = vmatprep.subr.bf16.mxu1 %v5161_v32  ;;  %v5236_v32 = vld [vmem:[%s6009_s26 + $0x5f0] ss:$12 sps:$4 sm:$0xff]  }
  0xc0   : > { %3712 = vmatpush1.bf16.msra.mxu0 %v5110_v20  ;;  %2273 = vmatmul.mubr.f32.vlgmr.msra.gmra.mrb[2].mxu1 %v6107_v34  ;;  %v6163_v20 = vld [vmem:[#allocation3 + $0x38] sm:$0xff] }
  0xc1   : > { %3714 = vmatprep.subr.bf16.mxu0 %v5113_v21  ;;  %3996 = vmatpush3.bf16.msra.mxu1 %v5162_v35  ;;  %v5185_v21 = vld [vmem:[%s6009_s26 + $0x300] ss:$12 sps:$4 sm:$0xff]   ;;  %v5203_v35 = vld [vmem:[%s6009_s26 + $0x364] ss:$12 sps:$4 sm:$0xff]  }
  0xc2   : > { %3998 = vmatprep.subr.bf16.mxu1 %v5166_v37  ;;  %2342 = vmatprep.mubr.f32.mxu1 %v6129_v54  ;;  %v6184_v37 = vld [vmem:[#allocation3 + $0x30] sm:$0xff] }
  0xc4   : > { %3716 = vmatpush1.bf16.msra.mxu0 %v5115_v24  ;;  %v5226_v24 = vld [vmem:[%s6009_s26 + $0x5c0] ss:$12 sps:$4 sm:$0xff]  }
  0xc5   : > { %3718 = vmatprep.subr.bf16.mxu0 %v5118_v26  ;;  %4000 = vmatpush3.bf16.msra.mxu1 %v5167_v40  ;;  %v5193_v26 = vld [vmem:[%s6009_s26 + $0x334] ss:$12 sps:$4 sm:$0xff]   ;;  %v5810_v40 = vmov 0.0|0.0  }
  0xc6   : > { %4002 = vmatprep.subr.bf16.mxu1 %v5171_v41  ;;  %v5210_v41 = vld [vmem:[%s6009_s26 + $0x378] ss:$12 sps:$4 sm:$0xff]  }
  0xc8   : > { %3720 = vmatpush1.bf16.msra.mxu0 %v5120_v29  ;;  %v5195_v29 = vld [vmem:[%s6009_s26 + $0x330] ss:$12 sps:$4 sm:$0xff]  }
  0xc9   : > { %3722 = vmatprep.subr.bf16.mxu0 %v5123_v30  ;;  %4004 = vmatpush3.bf16.msra.mxu1 %v5172_v44  ;;  %v5232_v30 = vld [vmem:[%s6009_s26 + $0x518] ss:$12 sps:$4 sm:$0xff]   ;;  %v5812_v44 = vmov 0.0  }
  0xca   : > { %4006 = vmatprep.subr.bf16.mxu1 %v5176_v45  ;;  %v5215_v45 = vld [vmem:[%s6009_s26 + $0x390] ss:$12 sps:$4 sm:$0xff]  }
  0xcc   : > { %3724 = vmatpush1.bf16.msra.mxu0 %v5125_v33  ;;  %v5200_v33 = vld [vmem:[%s6009_s26 + $0x348] ss:$12 sps:$4 sm:$0xff]  }
  0xcd   : > { %3726 = vmatprep.subr.bf16.mxu0 %v5128_v36  ;;  %4008 = vmatpush3.bf16.msra.mxu1 %v5177_v48  ;;  %v5205_v36 = vld [vmem:[%s6009_s26 + $0x360] ss:$12 sps:$4 sm:$0xff]   ;;  %v5220_v48 = vld [vmem:[%s6009_s26 + $0x3a8] ss:$12 sps:$4 sm:$0xff]  }
  0xce   : > { %4010 = vmatprep.subr.bf16.mxu1 %v5181_v49  ;;  %v5253_v49 = vld [vmem:[%s6009_s26 + $0x650] ss:$12 sps:$4 sm:$0xff]  }
  0xd0   : > { %3728 = vmatpush1.bf16.msra.mxu0 %v5130_v38  ;;  %v5241_v38 = vld [vmem:[%s6009_s26 + $0x608] ss:$12 sps:$4 sm:$0xff]  }
  0xd1   : > { %3730 = vmatprep.subr.bf16.mxu0 %v5133_v39  ;;  %4012 = vmatpush3.bf16.msra.mxu1 %v5182_v52  ;;  %v5208_v39 = vld [vmem:[%s6009_s26 + $0x37c] ss:$12 sps:$4 sm:$0xff]  }
  0xd2   : > { %4014 = vmatprep.subr.bf16.mxu1 %v5186_v53  ;;  %v5257_v52 = vld [vmem:[%s6009_s26 + $0x668] ss:$12 sps:$4 sm:$0xff]  }
  0xd3   : > { %v5228_v53 = vld [vmem:[%s6009_s26 + $0x3dc] ss:$12 sps:$4 sm:$0xff]  }
  0xd4   : > { %3732 = vmatpush1.bf16.msra.mxu0 %v5135_v42  ;;  %v5245_v42 = vld [vmem:[%s6009_s26 + $0x620] ss:$12 sps:$4 sm:$0xff]  }
  0xd5   : > { %3734 = vmatprep.subr.bf16.mxu0 %v5138_v43  ;;  %4016 = vmatpush3.bf16.msra.mxu1 %v5187_v57  ;;  %v5213_v43 = vld [vmem:[%s6009_s26 + $0x394] ss:$12 sps:$4 sm:$0xff]   ;;  %v5235_v57 = vld [vmem:[%s6009_s26 + $0x3f0] ss:$12 sps:$4 sm:$0xff]  }
  0xd6   : > { %4018 = vmatprep.subr.bf16.mxu1 %v5191_v58  ;;  %v5265_v58 = vld [vmem:[%s6009_s26 + $0x698] ss:$12 sps:$4 sm:$0xff]  }
  0xd8   : > { %3736 = vmatpush1.bf16.msra.mxu0 %v5140_v46  ;;  %v5249_v46 = vld [vmem:[%s6009_s26 + $0x638] ss:$12 sps:$4 sm:$0xff]  }
  0xd9   : > { %3738 = vmatprep.subr.bf16.mxu0 %v5143_v47  ;;  %4020 = vmatpush3.bf16.msra.mxu1 %v5192_v60  ;;  %v5218_v47 = vld [vmem:[%s6009_s26 + $0x3ac] ss:$12 sps:$4 sm:$0xff]   ;;  %v5240_v60 = vld [vmem:[%s6009_s26 + $0x408] ss:$12 sps:$4 sm:$0xff]  }
  0xda   : > { %4022 = vmatprep.subr.bf16.mxu1 %v5196_v62  ;;  %v5269_v62 = vld [vmem:[%s6009_s26 + $0x6b0] ss:$12 sps:$4 sm:$0xff]  }
  0xdc   : > { %3740 = vmatpush1.bf16.msra.mxu0 %v5145_v50  ;;  %v5223_v50 = vld [vmem:[%s6009_s26 + $0x3c4] ss:$12 sps:$4 sm:$0xff]  }
  0xdd   : > { %3742 = vmatprep.subr.bf16.mxu0 %v5148_v51  ;;  %4024 = vmatpush3.bf16.msra.mxu1 %v5197_v1  ;;  %v5225_v51 = vld [vmem:[%s6009_s26 + $0x3c0] ss:$12 sps:$4 sm:$0xff]   ;;  %v5246_v1 = vld [vmem:[%s6009_s26 + $0x43c] ss:$12 sps:$4 sm:$0xff]  }
  0xde   : > { %4026 = vmatprep.subr.bf16.mxu1 %v5201_v2  ;;  %v5248_v2 = vld [vmem:[%s6009_s26 + $0x438] ss:$12 sps:$4 sm:$0xff]  }
  0xe0   : > { %3744 = vmatpush1.bf16.msra.mxu0 %v5150_v55  ;;  %2343 = vmatmul.mubr.f32.vlgmr.msra.gmra.mrb[4].mxu1 %v6146_v5  ;;  %v5261_v55 = vld [vmem:[%s6009_s26 + $0x680] ss:$12 sps:$4 sm:$0xff]  }
  0xe1   : > { %3746 = vmatprep.subr.bf16.mxu0 %v5153_v56  ;;  %4028 = vmatpush3.bf16.msra.mxu1 %v5202_v6  ;;  %v5233_v56 = vld [vmem:[%s6009_s26 + $0x3f4] ss:$12 sps:$4 sm:$0xff]   ;;  %v5254_v6 = vld [vmem:[%s6009_s26 + $0x46c] ss:$12 sps:$4 sm:$0xff]  }
  0xe2   : > { %4030 = vmatprep.subr.bf16.mxu1 %v5206_v7  ;;  %2412 = vmatprep.mubr.f32.mxu1 %v6163_v20  ;;  %v5256_v7 = vld [vmem:[%s6009_s26 + $0x468] ss:$12 sps:$4 sm:$0xff]  }
  0xe4   : > { %3748 = vmatpush1.bf16.msra.mxu0 %v5155_v59  ;;  %v5238_v59 = vld [vmem:[%s6009_s26 + $0x40c] ss:$12 sps:$4 sm:$0xff]  }
  0xe5   : > { %3750 = vmatprep.subr.bf16.mxu0 %v5158_v61  ;;  %4032 = vmatpush3.bf16.msra.mxu1 %v5207_v10  ;;  %v5242_v61 = vld [vmem:[%s6009_s26 + $0x424] ss:$12 sps:$4 sm:$0xff]   ;;  %v5262_v10 = vld [vmem:[%s6009_s26 + $0x49c] ss:$12 sps:$4 sm:$0xff]  }
  0xe6   : > { %4034 = vmatprep.subr.bf16.mxu1 %v5211_v11  ;;  %v5264_v11 = vld [vmem:[%s6009_s26 + $0x498] ss:$12 sps:$4 sm:$0xff]  }
  0xe8   : > { %3752 = vmatpush1.bf16.msra.mxu0 %v5160_v63  ;;  %v5244_v63 = vld [vmem:[%s6009_s26 + $0x420] ss:$12 sps:$4 sm:$0xff]  }
  0xe9   : > { %3754 = vmatprep.subr.bf16.mxu0 %v5163_v0  ;;  %4036 = vmatpush3.bf16.msra.mxu1 %v5212_v14  ;;  %v6221_v0 = vld [vmem:[#allocation3 + $0x40] sm:$0xff] }
  0xea   : > { %4038 = vmatprep.subr.bf16.mxu1 %v5216_v15  ;;  %v5270_v14 = vld [vmem:[%s6009_s26 + $0x4cc] ss:$12 sps:$4 sm:$0xff]   ;;  %v5272_v15 = vld [vmem:[%s6009_s26 + $0x4c8] ss:$12 sps:$4 sm:$0xff]  }
  0xec   : > { %3756 = vmatpush1.bf16.msra.mxu0 %v5165_v3  ;;  %v5250_v3 = vld [vmem:[%s6009_s26 + $0x454] ss:$12 sps:$4 sm:$0xff]  }
  0xed   : > { %3758 = vmatprep.subr.bf16.mxu0 %v5168_v4  ;;  %4040 = vmatpush3.bf16.msra.mxu1 %v5217_v17  ;;  %v5252_v4 = vld [vmem:[%s6009_s26 + $0x450] ss:$12 sps:$4 sm:$0xff]  }
  0xee   : > { %4042 = vmatprep.subr.bf16.mxu1 %v5221_v19  ;;  %v5276_v17 = vld [vmem:[%s6009_s26 + $0x4fc] ss:$12 sps:$4 sm:$0xff]   ;;  %v5279_v19 = vld [vmem:[%s6009_s26 + $0x514] ss:$12 sps:$4 sm:$0xff]  }
  0xf0   : > { %3760 = vmatpush1.bf16.msra.mxu0 %v5170_v8  ;;  %v5258_v8 = vld [vmem:[%s6009_s26 + $0x484] ss:$12 sps:$4 sm:$0xff]  }
  0xf1   : > { %3762 = vmatprep.subr.bf16.mxu0 %v5173_v9  ;;  %4044 = vmatpush3.bf16.msra.mxu1 %v5222_v23  ;;  %v5260_v9 = vld [vmem:[%s6009_s26 + $0x480] ss:$12 sps:$4 sm:$0xff]   ;;  %v5285_v23 = vld [vmem:[%s6009_s26 + $0x544] ss:$12 sps:$4 sm:$0xff]  }
  0xf2   : > { %4046 = vmatprep.subr.bf16.mxu1 %v5226_v24  ;;  %v5287_v24 = vld [vmem:[%s6009_s26 + $0x540] ss:$12 sps:$4 sm:$0xff]  }
  0xf4   : > { %3764 = vmatpush1.bf16.msra.mxu0 %v5175_v12  ;;  %v5266_v12 = vld [vmem:[%s6009_s26 + $0x4b4] ss:$12 sps:$4 sm:$0xff]  }
  0xf5   : > { %3766 = vmatprep.subr.bf16.mxu0 %v5178_v13  ;;  %4048 = vmatpush3.bf16.msra.mxu1 %v5227_v27  ;;  %v5268_v13 = vld [vmem:[%s6009_s26 + $0x4b0] ss:$12 sps:$4 sm:$0xff]   ;;  %v5291_v27 = vld [vmem:[%s6009_s26 + $0x574] ss:$12 sps:$4 sm:$0xff]  }
  0xf6   : > { %4050 = vmatprep.subr.bf16.mxu1 %v5231_v28  ;;  %v5293_v28 = vld [vmem:[%s6009_s26 + $0x570] ss:$12 sps:$4 sm:$0xff]  }
  0xf8   : > { %3768 = vmatpush1.bf16.msra.mxu0 %v5180_v16  ;;  %v5273_v16 = vld [vmem:[%s6009_s26 + $0x4e4] ss:$12 sps:$4 sm:$0xff]  }
  0xf9   : > { %3770 = vmatprep.subr.bf16.mxu0 %v5183_v18  ;;  %4052 = vmatpush3.bf16.msra.mxu1 %v5232_v30  ;;  %v5278_v18 = vld [vmem:[%s6009_s26 + $0x4f8] ss:$12 sps:$4 sm:$0xff]   ;;  %v5296_v30 = vld [vmem:[%s6009_s26 + $0x588] ss:$12 sps:$4 sm:$0xff]  }
  0xfa   : > { %4054 = vmatprep.subr.bf16.mxu1 %v5236_v32  ;;  %v5299_v32 = vld [vmem:[%s6009_s26 + $0x5a0] ss:$12 sps:$4 sm:$0xff]  }
  0xfb   : > { %1919 = vmatmul.mubr.f32.vlgmr.msra.gmra.mrb[0].mxu0 %v6107_v34  ;;  %v5237_v34 = vld [vmem:[%s6009_s26 + $0x530] ss:$12 sps:$4 sm:$0xff]  }
  0xfc   : > { %3772 = vmatpush1.bf16.msra.mxu0 %v5185_v21  ;;  %1989 = vmatprep.mubr.f32.mxu0 %v6129_v54  ;;  %v5230_v54 = vld [vmem:[%s6009_s26 + $0x3d8] ss:$12 sps:$4 sm:$0xff]  }
  0xfd   : > { %3774 = vmatprep.subr.bf16.mxu0 %v5188_v22  ;;  %4056 = vmatpush3.bf16.msra.mxu1 %v5237_v34  ;;  %v5282_v21 = vld [vmem:[%s6009_s26 + $0x52c] ss:$12 sps:$4 sm:$0xff]   ;;  %v5284_v22 = vld [vmem:[%s6009_s26 + $0x528] ss:$12 sps:$4 sm:$0xff]  }
  0xfe   : > { %4057 = vmatprep.subr.bf16.mxu1 %v5810_v40  ;;  %v5302_v34 = vld [vmem:[%s6009_s26 + $0x5b8] ss:$12 sps:$4 sm:$0xff]  }
 0x100   : > { %3776 = vmatpush1.bf16.msra.mxu0 %v5190_v25  ;;  %2413 = vmatmul.mubr.f32.vlgmr.msra.gmra.mrb[6].mxu1 %v6184_v37  ;;  %v5288_v25 = vld [vmem:[%s6009_s26 + $0x55c] ss:$12 sps:$4 sm:$0xff]  }
 0x101   : > { %3778 = vmatprep.subr.bf16.mxu0 %v5193_v26  ;;  %4059 = vmatpush3.bf16.msra.mxu1 %v5241_v38  ;;  %v5290_v26 = vld [vmem:[%s6009_s26 + $0x558] ss:$12 sps:$4 sm:$0xff]  }
 0x102   : > { %4060 = vmatprep.subr.bf16.mxu1 %v5810_v40  ;;  %3603 = vmatprep.mubr.msk.f32.mxu1 %vm5811_vm0, %v5812_v44  ;;  %v5306_v38 = vld [vmem:[%s6009_s26 + $0x5ec] ss:$12 sps:$4 sm:$0xff]  }
 0x104   : > { %3780 = vmatpush1.bf16.msra.mxu0 %v5195_v29  ;;  %v5294_v29 = vld [vmem:[%s6009_s26 + $0x58c] ss:$12 sps:$4 sm:$0xff]  }
 0x105   : > { %3782 = vmatprep.subr.bf16.mxu0 %v5198_v31  ;;  %4062 = vmatpush3.bf16.msra.mxu1 %v5245_v42  ;;  %v5297_v31 = vld [vmem:[%s6009_s26 + $0x5a4] ss:$12 sps:$4 sm:$0xff]   ;;  %v5311_v42 = vld [vmem:[%s6009_s26 + $0x600] ss:$12 sps:$4 sm:$0xff]  }
 0x106   : > { %4063 = vmatprep.subr.bf16.mxu1 %v5810_v40 }
 0x108   : > { %3784 = vmatpush1.bf16.msra.mxu0 %v5200_v33  ;;  %v5300_v33 = vld [vmem:[%s6009_s26 + $0x5bc] ss:$12 sps:$4 sm:$0xff]  }
 0x109   : > { %3786 = vmatprep.subr.bf16.mxu0 %v5203_v35  ;;  %4065 = vmatpush3.bf16.msra.mxu1 %v5249_v46  ;;  %v5303_v35 = vld [vmem:[%s6009_s26 + $0x5d4] ss:$12 sps:$4 sm:$0xff]  }
 0x10a   : > { %4066 = vmatprep.subr.bf16.mxu1 %v5810_v40  ;;  %v5315_v46 = vld [vmem:[%s6009_s26 + $0x634] ss:$12 sps:$4 sm:$0xff]  }
 0x10c   : > { %3788 = vmatpush1.bf16.msra.mxu0 %v5205_v36  ;;  %v5305_v36 = vld [vmem:[%s6009_s26 + $0x5d0] ss:$12 sps:$4 sm:$0xff]  }
 0x10d   : > { %3790 = vmatprep.subr.bf16.mxu0 %v5208_v39  ;;  %4068 = vmatpush3.bf16.msra.mxu1 %v5253_v49  ;;  %v5308_v39 = vld [vmem:[%s6009_s26 + $0x5e8] ss:$12 sps:$4 sm:$0xff]   ;;  %v5317_v49 = vld [vmem:[%s6009_s26 + $0x630] ss:$12 sps:$4 sm:$0xff]  }
 0x10e   : > { %4069 = vmatprep.subr.bf16.mxu1 %v5810_v40 }
 0x110   : > { %3792 = vmatpush1.bf16.msra.mxu0 %v5210_v41  ;;  %v5309_v41 = vld [vmem:[%s6009_s26 + $0x604] ss:$12 sps:$4 sm:$0xff]  }
 0x111   : > { %3794 = vmatprep.subr.bf16.mxu0 %v5213_v43  ;;  %4071 = vmatpush3.bf16.msra.mxu1 %v5257_v52  ;;  %v5312_v43 = vld [vmem:[%s6009_s26 + $0x61c] ss:$12 sps:$4 sm:$0xff]   ;;  %v5335_v52 = vld [vmem:[%s6022_s24] ss:$36 sps:$4 sm:$0xff]  }
 0x112   : > { %4072 = vmatprep.subr.bf16.mxu1 %v5810_v40 }
 0x114   : > { %3796 = vmatpush1.bf16.msra.mxu0 %v5215_v45  ;;  %v5314_v45 = vld [vmem:[%s6009_s26 + $0x618] ss:$12 sps:$4 sm:$0xff]  }
 0x115   : > { %3798 = vmatprep.subr.bf16.mxu0 %v5218_v47  ;;  %4074 = vmatpush3.bf16.msra.mxu1 %v5261_v55  ;;  %v5341_v55 = vld [vmem:[%s6022_s24 + $0x48] ss:$36 sps:$4 sm:$0xff]  }
 0x116   : > { %4075 = vmatprep.subr.bf16.mxu1 %v5810_v40 }
 0x118   : > { %3800 = vmatpush1.bf16.msra.mxu0 %v5220_v48 }
 0x119   : > { %3802 = vmatprep.subr.bf16.mxu0 %v5223_v50  ;;  %4077 = vmatpush3.bf16.msra.mxu1 %v5265_v58  ;;  %v5323_v58 = vld [vmem:[%s6009_s26 + $0x660] ss:$12 sps:$4 sm:$0xff]  }
 0x11a   : > { %4078 = vmatprep.subr.bf16.mxu1 %v5810_v40 }
 0x11c   : > { %3804 = vmatpush1.bf16.msra.mxu0 %v5225_v51  ;;  %v5318_v51 = vld [vmem:[%s6009_s26 + $0x64c] ss:$12 sps:$4 sm:$0xff]  }
 0x11d   : > { %3806 = vmatprep.subr.bf16.mxu0 %v5228_v53  ;;  %4080 = vmatpush3.bf16.msra.mxu1 %v5269_v62  ;;  %v5339_v53 = vld [vmem:[%s6022_s24 + $0x4c] ss:$36 sps:$4 sm:$0xff]   ;;  %v5326_v62 = vld [vmem:[%s6009_s26 + $0x678] ss:$12 sps:$4 sm:$0xff]  }
 0x120   : > { %3808 = vmatpush1.bf16.msra.mxu0 %v5230_v54  ;;  %3604 = vmatmul.mubr.f32.vlgmr.msra.gmra.mrb[8].mxu1 %v6221_v0  ;;  %v5320_v54 = vld [vmem:[%s6009_s26 + $0x648] ss:$12 sps:$4 sm:$0xff]  }
 0x121   : > { %3810 = vmatprep.subr.bf16.mxu0 %v5233_v56  ;;  %v5321_v56 = vld [vmem:[%s6009_s26 + $0x664] ss:$12 sps:$4 sm:$0xff]  }
 0x124   : > { %3812 = vmatpush1.bf16.msra.mxu0 %v5235_v57  ;;  %v5345_v57 = vld [vmem:[%s6022_s24 + $0x94] ss:$36 sps:$4 sm:$0xff]  }
 0x125   : > { %3814 = vmatprep.subr.bf16.mxu0 %v5238_v59  ;;  %v5347_v59 = vld [vmem:[%s6022_s24 + $0x90] ss:$36 sps:$4 sm:$0xff]  }
 0x128   : > { %3816 = vmatpush1.bf16.msra.mxu0 %v5240_v60  ;;  %v5324_v60 = vld [vmem:[%s6009_s26 + $0x67c] ss:$12 sps:$4 sm:$0xff]  }
 0x129   : > { %3818 = vmatprep.subr.bf16.mxu0 %v5242_v61  ;;  %v5351_v61 = vld [vmem:[%s6022_s24 + $0xdc] ss:$36 sps:$4 sm:$0xff]  }
 0x12c   : > { %3820 = vmatpush1.bf16.msra.mxu0 %v5244_v63  ;;  %v5353_v63 = vld [vmem:[%s6022_s24 + $0xd8] ss:$36 sps:$4 sm:$0xff]  }
 0x12d   : > { %3822 = vmatprep.subr.bf16.mxu0 %v5246_v1  ;;  %v5327_v1 = vld [vmem:[%s6009_s26 + $0x694] ss:$12 sps:$4 sm:$0xff]  }
 0x130   : > { %3824 = vmatpush1.bf16.msra.mxu0 %v5248_v2  ;;  %v5357_v2 = vld [vmem:[%s6022_s24 + $0x124] ss:$36 sps:$4 sm:$0xff]  }
 0x131   : > { %3826 = vmatprep.subr.bf16.mxu0 %v5250_v3  ;;  %v1768_v3 = vlaneseq }
 0x134   : > { %3828 = vmatpush1.bf16.msra.mxu0 %v5252_v4  ;;  %v5329_v4 = vld [vmem:[%s6009_s26 + $0x690] ss:$12 sps:$4 sm:$0xff]  }
 0x135   : > { %3830 = vmatprep.subr.bf16.mxu0 %v5254_v6  ;;  %v5359_v6 = vld [vmem:[%s6022_s24 + $0x120] ss:$36 sps:$4 sm:$0xff]  }
 0x138   : > { %3832 = vmatpush1.bf16.msra.mxu0 %v5256_v7  ;;  %v5330_v7 = vld [vmem:[%s6009_s26 + $0x6ac] ss:$12 sps:$4 sm:$0xff]  }
 0x139   : > { %3834 = vmatprep.subr.bf16.mxu0 %v5258_v8  ;;  %v5363_v8 = vld [vmem:[%s6022_s24 + $0x16c] ss:$36 sps:$4 sm:$0xff]  }
 0x13b   : > { %1990 = vmatmul.mubr.f32.vlgmr.msra.gmra.mrb[0].mxu0 %v6146_v5  ;;  %v5275_v5 = vld [vmem:[%s6009_s26 + $0x4e0] ss:$12 sps:$4 sm:$0xff]  }
 0x13c   : > { %3836 = vmatpush1.bf16.msra.mxu0 %v5260_v9  ;;  %2060 = vmatprep.mubr.f32.mxu0 %v6163_v20  ;;  %v5281_v20 = vld [vmem:[%s6009_s26 + $0x510] ss:$12 sps:$4 sm:$0xff]   ;;  %v6294_v9 = vshrl.u32 %v1768_v3, 7  ;;  %v5408_v3 = vld [vmem:[%s6022_s24 + $0x374] ss:$36 sps:$4 sm:$0xff]  }
 0x13d   : > { %3838 = vmatprep.subr.bf16.mxu0 %v5262_v10  ;;  %v5332_v10 = vld [vmem:[%s6009_s26 + $0x6a8] ss:$12 sps:$4 sm:$0xff]  }
 0x140   : > { %3840 = vmatpush1.bf16.msra.mxu0 %v5264_v11  ;;  %v5365_v11 = vld [vmem:[%s6022_s24 + $0x168] ss:$36 sps:$4 sm:$0xff]  }
 0x141   : > { %3842 = vmatprep.subr.bf16.mxu0 %v5266_v12  ;;  %v5336_v12 = vld [vmem:[%s6022_s24 + $0x14] ss:$36 sps:$4 sm:$0xff]  }
 0x144   : > { %3844 = vmatpush1.bf16.msra.mxu0 %v5268_v13  ;;  %v5369_v13 = vld [vmem:[%s6022_s24 + $0x1b4] ss:$36 sps:$4 sm:$0xff]  }
 0x145   : > { %3846 = vmatprep.subr.bf16.mxu0 %v5270_v14  ;;  %v1778_v14 = vsub.s32 2, %v6294_v9 }
 0x148   : > { %3848 = vmatpush1.bf16.msra.mxu0 %v5272_v15  ;;  %v6306_v15 = vld [vmem:[%s300_s15] sm:$0x7] }
 0x149   : > { %3850 = vmatprep.subr.bf16.mxu0 %v5273_v16  ;;  %v5338_v16 = vld [vmem:[%s6022_s24 + $0x10] ss:$36 sps:$4 sm:$0xff]  }
 0x14c   : > { %3852 = vmatpush1.bf16.msra.mxu0 %v5275_v5  ;;  %v5371_v5 = vld [vmem:[%s6022_s24 + $0x1b0] ss:$36 sps:$4 sm:$0xff]  }
 0x14d   : > { %3854 = vmatprep.subr.bf16.mxu0 %v5276_v17  ;;  %v5342_v17 = vld [vmem:[%s6022_s24 + $0x5c] ss:$36 sps:$4 sm:$0xff]  }
 0x150   : > { %3856 = vmatpush1.bf16.msra.mxu0 %v5278_v18  ;;  %v5375_v18 = vld [vmem:[%s6022_s24 + $0x1fc] ss:$36 sps:$4 sm:$0xff]  }
 0x151   : > { %3858 = vmatprep.subr.bf16.mxu0 %v5279_v19  ;;  %v1779_v19 = vrot.slane %v6306_v15, %v1778_v14 }
 0x154   : > { %3860 = vmatpush1.bf16.msra.mxu0 %v5281_v20  ;;  %v5344_v20 = vld [vmem:[%s6022_s24 + $0x58] ss:$36 sps:$4 sm:$0xff]  }
 0x155   : > { %3862 = vmatprep.subr.bf16.mxu0 %v5282_v21  ;;  %v5377_v21 = vld [vmem:[%s6022_s24 + $0x1f8] ss:$36 sps:$4 sm:$0xff]  }
 0x158   : > { %3864 = vmatpush1.bf16.msra.mxu0 %v5284_v22  ;;  %v5348_v22 = vld [vmem:[%s6022_s24 + $0xa4] ss:$36 sps:$4 sm:$0xff]  }
 0x159   : > { %3866 = vmatprep.subr.bf16.mxu0 %v5285_v23  ;;  %v5381_v23 = vld [vmem:[%s6022_s24 + $0x244] ss:$36 sps:$4 sm:$0xff]  }
 0x15c   : > { %3868 = vmatpush1.bf16.msra.mxu0 %v5287_v24 }
 0x15d   : > { %3870 = vmatprep.subr.bf16.mxu0 %v5288_v25 }
 0x160   : > { %3872 = vmatpush1.bf16.msra.mxu0 %v5290_v26 }
 0x161   : > { %3874 = vmatprep.subr.bf16.mxu0 %v5291_v27 }
 0x164   : > { %3876 = vmatpush1.bf16.msra.mxu0 %v5293_v28  ;;  %v5383_v28 = vld [vmem:[%s6022_s24 + $0x240] ss:$36 sps:$4 sm:$0xff]  }
 0x165   : > { %3878 = vmatprep.subr.bf16.mxu0 %v5294_v29  ;;  %v5354_v29 = vld [vmem:[%s6022_s24 + $0xec] ss:$36 sps:$4 sm:$0xff]  }
 0x168   : > { %3880 = vmatpush1.bf16.msra.mxu0 %v5296_v30  ;;  %v5387_v30 = vld [vmem:[%s6022_s24 + $0x28c] ss:$36 sps:$4 sm:$0xff]  }
 0x169   : > { %3882 = vmatprep.subr.bf16.mxu0 %v5297_v31 }
 0x16c   : > { %3884 = vmatpush1.bf16.msra.mxu0 %v5299_v32  ;;  %v5356_v32 = vld [vmem:[%s6022_s24 + $0xe8] ss:$36 sps:$4 sm:$0xff]  }
 0x16d   : > { %3886 = vmatprep.subr.bf16.mxu0 %v5300_v33  ;;  %v5389_v33 = vld [vmem:[%s6022_s24 + $0x288] ss:$36 sps:$4 sm:$0xff]  }
 0x170   : > { %3888 = vmatpush1.bf16.msra.mxu0 %v5302_v34  ;;  %v5360_v34 = vld [vmem:[%s6022_s24 + $0x134] ss:$36 sps:$4 sm:$0xff]  }
 0x171   : > { %3890 = vmatprep.subr.bf16.mxu0 %v5303_v35  ;;  %v5393_v35 = vld [vmem:[%s6022_s24 + $0x2d4] ss:$36 sps:$4 sm:$0xff]  }
 0x172   : > { %v3394_v47 = vpop.f32.mrb[0].mxu1 }
 0x173   : > { %v3395_v48 = vpop.f32.mrb[1].mxu1 }
 0x174   : > { %3892 = vmatpush1.bf16.msra.mxu0 %v5305_v36  ;;  %v6272_v50 = vadd.f32 %v3395_v48, %v3394_v47  ;;  %v5362_v36 = vld [vmem:[%s6022_s24 + $0x130] ss:$36 sps:$4 sm:$0xff]   ;;  %v5374_v47 = vld [vmem:[%s6022_s24 + $0x1c0] ss:$36 sps:$4 sm:$0xff]  }
 0x175   : > { %3894 = vmatprep.subr.bf16.mxu0 %v5306_v38  ;;  %v5395_v38 = vld [vmem:[%s6022_s24 + $0x2d0] ss:$36 sps:$4 sm:$0xff]   ;;  %v5407_v48 = vld [vmem:[%s6022_s24 + $0x360] ss:$36 sps:$4 sm:$0xff]  }
 0x176   : > { %v2205_v24 = vadd.f32 %v6272_v50, %v1779_v19  ;;  %v5411_v50 = vld [vmem:[%s6022_s24 + $0x3ac] ss:$36 sps:$4 sm:$0xff]   ;;  %v5429_v19 = vld [vmem:[%s6022_s24 + $0x484] ss:$36 sps:$4 sm:$0xff]  }
 0x178   : > { %3896 = vmatpush1.bf16.msra.mxu0 %v5308_v39  ;;  %v5366_v39 = vld [vmem:[%s6022_s24 + $0x17c] ss:$36 sps:$4 sm:$0xff]  }
 0x179   : > { %3898 = vmatprep.subr.bf16.mxu0 %v5309_v41  ;;  %v5399_v41 = vld [vmem:[%s6022_s24 + $0x31c] ss:$36 sps:$4 sm:$0xff]  }
 0x17b   : > { %2061 = vmatmul.mubr.f32.vlgmr.msra.gmra.mrb[0].mxu0 %v6184_v37  ;;  %v5333_v37 = vld [vmem:[%s6022_s24 + $0x4] ss:$36 sps:$4 sm:$0xff]  }
 0x17c   : > { %3900 = vmatpush1.bf16.msra.mxu0 %v5311_v42  ;;  %2131 = vmatprep.mubr.f32.mxu0 %v5812_v44  ;;  %v5368_v42 = vld [vmem:[%s6022_s24 + $0x178] ss:$36 sps:$4 sm:$0xff]  }
 0x17d   : > { %3902 = vmatprep.subr.bf16.mxu0 %v5312_v43  ;;  %4082 = vmatprep.subr.bf16.mxu1 %v5333_v37  ;;  %v5401_v43 = vld [vmem:[%s6022_s24 + $0x318] ss:$36 sps:$4 sm:$0xff]   ;;  %v5413_v37 = vld [vmem:[%s6022_s24 + $0x3a8] ss:$36 sps:$4 sm:$0xff]  }
 0x17e   : > { %4084 = vmatpush1.bf16.msra.mxu1 %v5335_v52  ;;  %v5384_v52 = vld [vmem:[%s6022_s24 + $0x254] ss:$36 sps:$4 sm:$0xff]  }
 0x17f   : > { %4086 = vmatprep.subr.bf16.mxu1 %v5339_v53  ;;  %v5417_v53 = vld [vmem:[%s6022_s24 + $0x3f4] ss:$36 sps:$4 sm:$0xff]  }
 0x180   : > { %3904 = vmatpush1.bf16.msra.mxu0 %v5314_v45  ;;  %v5372_v45 = vld [vmem:[%s6022_s24 + $0x1c4] ss:$36 sps:$4 sm:$0xff]  }
 0x181   : > { %3906 = vmatprep.subr.bf16.mxu0 %v5315_v46  ;;  %v5405_v46 = vld [vmem:[%s6022_s24 + $0x364] ss:$36 sps:$4 sm:$0xff]  }
 0x182   : > { %4088 = vmatpush1.bf16.msra.mxu1 %v5341_v55  ;;  %v5419_v55 = vld [vmem:[%s6022_s24 + $0x3f0] ss:$36 sps:$4 sm:$0xff]  }
 0x183   : > { %4090 = vmatprep.subr.bf16.mxu1 %v5345_v57  ;;  %v5392_v57 = vld [vmem:[%s6022_s24 + $0x298] ss:$36 sps:$4 sm:$0xff]  }
 0x184   : > { %3908 = vmatpush1.bf16.msra.mxu0 %v5317_v49  ;;  %v5378_v49 = vld [vmem:[%s6022_s24 + $0x20c] ss:$36 sps:$4 sm:$0xff]  }
 0x185   : > { %3910 = vmatprep.subr.bf16.mxu0 %v5318_v51  ;;  %v5380_v51 = vld [vmem:[%s6022_s24 + $0x208] ss:$36 sps:$4 sm:$0xff]  }
 0x186   : > { %4092 = vmatpush1.bf16.msra.mxu1 %v5347_v59 }
 0x187   : > { %4094 = vmatprep.subr.bf16.mxu1 %v5351_v61 }
 0x188   : > { %3912 = vmatpush1.bf16.msra.mxu0 %v5320_v54  ;;  %v5386_v54 = vld [vmem:[%s6022_s24 + $0x250] ss:$36 sps:$4 sm:$0xff]  }
 0x189   : > { %3914 = vmatprep.subr.bf16.mxu0 %v5321_v56  ;;  %v5390_v56 = vld [vmem:[%s6022_s24 + $0x29c] ss:$36 sps:$4 sm:$0xff]  }
 0x18a   : > { %4096 = vmatpush1.bf16.msra.mxu1 %v5353_v63  ;;  %v5402_v63 = vld [vmem:[%s6022_s24 + $0x32c] ss:$36 sps:$4 sm:$0xff]  }
 0x18b   : > { %4098 = vmatprep.subr.bf16.mxu1 %v5357_v2  ;;  %v5404_v2 = vld [vmem:[%s6022_s24 + $0x328] ss:$36 sps:$4 sm:$0xff]  }
 0x18c   : > { %3916 = vmatpush1.bf16.msra.mxu0 %v5323_v58  ;;  %v5396_v58 = vld [vmem:[%s6022_s24 + $0x2e4] ss:$36 sps:$4 sm:$0xff]  }
 0x18d   : > { %3918 = vmatprep.subr.bf16.mxu0 %v5324_v60 }
 0x18e   : > { %4100 = vmatpush1.bf16.msra.mxu1 %v5359_v6  ;;  %v5414_v6 = vld [vmem:[%s6022_s24 + $0x3bc] ss:$36 sps:$4 sm:$0xff]  }
 0x18f   : > { %4102 = vmatprep.subr.bf16.mxu1 %v5363_v8  ;;  %v5420_v8 = vld [vmem:[%s6022_s24 + $0x404] ss:$36 sps:$4 sm:$0xff]  }
 0x190   : > { %3920 = vmatpush1.bf16.msra.mxu0 %v5326_v62  ;;  %v5398_v62 = vld [vmem:[%s6022_s24 + $0x2e0] ss:$36 sps:$4 sm:$0xff]  }
 0x191   : > { %3922 = vmatprep.subr.bf16.mxu0 %v5327_v1 }
 0x192   : > { %4104 = vmatpush1.bf16.msra.mxu1 %v5365_v11 }
 0x193   : > { %4106 = vmatprep.subr.bf16.mxu1 %v5369_v13  ;;  %v3429_v25 = vpop.f32.mrb[2].mxu1 }
 0x194   : > { %3924 = vmatpush1.bf16.msra.mxu0 %v5329_v4  ;;  %v3430_v26 = vpop.f32.mrb[3].mxu1  ;;  %v5410_v4 = vld [vmem:[%s6022_s24 + $0x370] ss:$36 sps:$4 sm:$0xff]  }
 0x195   : > { %3926 = vmatprep.subr.bf16.mxu0 %v5330_v7  ;;  %v3431_v27 = vadd.f32 %v3430_v26, %v3429_v25  ;;  %v5416_v7 = vld [vmem:[%s6022_s24 + $0x3b8] ss:$36 sps:$4 sm:$0xff]   ;;  %v1774_v25 = vsub.s32 1, %v6294_v9 }
 0x196   : > { %4108 = vmatpush1.bf16.msra.mxu1 %v5371_v5  ;;  %v5426_v5 = vld [vmem:[%s6022_s24 + $0x44c] ss:$36 sps:$4 sm:$0xff]  }
 0x197   : > { %4110 = vmatprep.subr.bf16.mxu1 %v5375_v18  ;;  %v2275_v31 = vadd.f32 %v3431_v27, %v2205_v24  ;;  %v5428_v18 = vld [vmem:[%s6022_s24 + $0x448] ss:$36 sps:$4 sm:$0xff]   ;;  %v1770_v24 = vsub.s32 0, %v6294_v9  ;;  %v1775_v27 = vrot.slane %v6306_v15, %v1774_v25  ;;  %v5438_v9 = vld [vmem:[%s6022_s24 + $0x4dc] ss:$36 sps:$4 sm:$0xff]  }
 0x198   : > { %3928 = vmatpush1.bf16.msra.mxu0 %v5332_v10  ;;  %v5422_v10 = vld [vmem:[%s6022_s24 + $0x400] ss:$36 sps:$4 sm:$0xff]   ;;  %v5504_v25 = vld [vmem:[%s6022_s24 + $0x170] ss:$36 sps:$4 sm:$0xff]  }
 0x199   : > { %4274 = vmatprep.subr.bf16.mxu0 %v5336_v12  ;;  %v1771_v26 = vrot.slane %v6306_v15, %v1770_v24  ;;  %v5437_v15 = vld [vmem:[%s6022_s24 + $0x4c8] ss:$36 sps:$4 sm:$0xff]  }
 0x19a   : > { %4112 = vmatpush1.bf16.msra.mxu1 %v5377_v21  ;;  %v5505_v24 = vld [vmem:[%s6022_s24 + $0x3c8] ss:$36 sps:$4 sm:$0xff]  }
 0x19b   : > { %2132 = vmatmul.mubr.f32.vlgmr.msra.gmra.mrb[0].mxu0 %v6221_v0  ;;  %v5350_v0 = vld [vmem:[%s6022_s24 + $0xa0] ss:$36 sps:$4 sm:$0xff]   ;;  %4114 = vmatprep.subr.bf16.mxu1 %v5381_v23 }
 0x19c   : > { %4276 = vmatpush1.bf16.msra.mxu0 %v5338_v16  ;;  %v5423_v16 = vld [vmem:[%s6022_s24 + $0x43c] ss:$36 sps:$4 sm:$0xff]  }
 0x19d   : > { %4278 = vmatprep.subr.bf16.mxu0 %v5342_v17  ;;  %v5425_v17 = vld [vmem:[%s6022_s24 + $0x438] ss:$36 sps:$4 sm:$0xff]  }
 0x19e   : > { %4116 = vmatpush1.bf16.msra.mxu1 %v5383_v28 }
 0x19f   : > { %4118 = vmatprep.subr.bf16.mxu1 %v5387_v30 }
 0x1a0   : > { %4280 = vmatpush1.bf16.msra.mxu0 %v5344_v20  ;;  %v5432_v20 = vld [vmem:[%s6022_s24 + $0x494] ss:$36 sps:$4 sm:$0xff]  }
 0x1a1   : > { %4282 = vmatprep.subr.bf16.mxu0 %v5348_v22 }
 0x1a2   : > { %4120 = vmatpush1.bf16.msra.mxu1 %v5389_v33  ;;  %v5434_v33 = vld [vmem:[%s6022_s24 + $0x490] ss:$36 sps:$4 sm:$0xff]  }
 0x1a3   : > { %4122 = vmatprep.subr.bf16.mxu1 %v5393_v35  ;;  %v5435_v35 = vld [vmem:[%s6022_s24 + $0x4cc] ss:$36 sps:$4 sm:$0xff]  }
 0x1a4   : > { %4284 = vmatpush1.bf16.msra.mxu0 %v5350_v0 }
 0x1a5   : > { %4286 = vmatprep.subr.bf16.mxu0 %v5354_v29 }
 0x1a6   : > { %4124 = vmatpush1.bf16.msra.mxu1 %v5395_v38  ;;  %v5441_v38 = vld [vmem:[%s6022_s24 + $0x514] ss:$36 sps:$4 sm:$0xff]  }
 0x1a7   : > { %4126 = vmatprep.subr.bf16.mxu1 %v5399_v41  ;;  %v5443_v41 = vld [vmem:[%s6022_s24 + $0x510] ss:$36 sps:$4 sm:$0xff]  }
 0x1a8   : > { %4288 = vmatpush1.bf16.msra.mxu0 %v5356_v32  ;;  %v5431_v32 = vld [vmem:[%s6022_s24 + $0x480] ss:$36 sps:$4 sm:$0xff]  }
 0x1a9   : > { %4290 = vmatprep.subr.bf16.mxu0 %v5360_v34 }
 0x1aa   : > { %4128 = vmatpush1.bf16.msra.mxu1 %v5401_v43  ;;  %v5447_v43 = vld [vmem:[%s6022_s24 + $0x55c] ss:$36 sps:$4 sm:$0xff]  }
 0x1ab   : > { %4130 = vmatprep.subr.bf16.mxu1 %v5405_v46  ;;  %v5449_v46 = vld [vmem:[%s6022_s24 + $0x558] ss:$36 sps:$4 sm:$0xff]  }
 0x1ac   : > { %4292 = vmatpush1.bf16.msra.mxu0 %v5362_v36  ;;  %v5440_v36 = vld [vmem:[%s6022_s24 + $0x4d8] ss:$36 sps:$4 sm:$0xff]  }
 0x1ad   : > { %4294 = vmatprep.subr.bf16.mxu0 %v5366_v39  ;;  %v5444_v39 = vld [vmem:[%s6022_s24 + $0x524] ss:$36 sps:$4 sm:$0xff]  }
 0x1ae   : > { %4132 = vmatpush1.bf16.msra.mxu1 %v5407_v48  ;;  %v5453_v48 = vld [vmem:[%s6022_s24 + $0x5a4] ss:$36 sps:$4 sm:$0xff]  }
 0x1af   : > { %4134 = vmatprep.subr.bf16.mxu1 %v5411_v50  ;;  %v5455_v50 = vld [vmem:[%s6022_s24 + $0x5a0] ss:$36 sps:$4 sm:$0xff]  }
 0x1b0   : > { %4296 = vmatpush1.bf16.msra.mxu0 %v5368_v42  ;;  %v5446_v42 = vld [vmem:[%s6022_s24 + $0x520] ss:$36 sps:$4 sm:$0xff]  }
 0x1b1   : > { %4298 = vmatprep.subr.bf16.mxu0 %v5372_v45  ;;  %v5450_v45 = vld [vmem:[%s6022_s24 + $0x56c] ss:$36 sps:$4 sm:$0xff]  }
 0x1b2   : > { %4136 = vmatpush1.bf16.msra.mxu1 %v5413_v37  ;;  %v5459_v37 = vld [vmem:[%s6022_s24 + $0x5ec] ss:$36 sps:$4 sm:$0xff]  }
 0x1b3   : > { %4138 = vmatprep.subr.bf16.mxu1 %v5417_v53  ;;  %v3464_v59 = vpop.f32.mrb[4].mxu1  ;;  %v5461_v53 = vld [vmem:[%s6022_s24 + $0x5e8] ss:$36 sps:$4 sm:$0xff]  }
 0x1b4   : > { %4300 = vmatpush1.bf16.msra.mxu0 %v5374_v47  ;;  %v3465_v60 = vpop.f32.mrb[5].mxu1  ;;  %v5452_v47 = vld [vmem:[%s6022_s24 + $0x568] ss:$36 sps:$4 sm:$0xff]  }
 0x1b5   : > { %4302 = vmatprep.subr.bf16.mxu0 %v5378_v49  ;;  %v3466_v61 = vadd.f32 %v3465_v60, %v3464_v59  ;;  %v5456_v49 = vld [vmem:[%s6022_s24 + $0x5b4] ss:$36 sps:$4 sm:$0xff]   ;;  %v5471_v59 = vld [vmem:[%s6022_s24 + $0x67c] ss:$36 sps:$4 sm:$0xff]   ;;  %v5474_v60 = vld [vmem:[%s6022_s24 + $0x68c] ss:$36 sps:$4 sm:$0xff]  }
 0x1b6   : > { %4140 = vmatpush1.bf16.msra.mxu1 %v5419_v55  ;;  %v5465_v55 = vld [vmem:[%s6022_s24 + $0x634] ss:$36 sps:$4 sm:$0xff]  }
 0x1b7   : > { %v2345_v1 = vadd.f32 %v3466_v61, %v2275_v31  ;;  %4142 = vmatprep.subr.bf16.mxu1 %v5423_v16  ;;  %v5473_v61 = vld [vmem:[%s6022_s24 + $0x678] ss:$36 sps:$4 sm:$0xff]   ;;  %v5492_v16 = vld [vmem:[%s6022_s24 + $0xe4] ss:$36 sps:$4 sm:$0xff]  }
 0x1b8   : > { %4304 = vmatpush1.bf16.msra.mxu0 %v5380_v51  ;;  %v5458_v51 = vld [vmem:[%s6022_s24 + $0x5b0] ss:$36 sps:$4 sm:$0xff]  }
 0x1b9   : > { %4306 = vmatprep.subr.bf16.mxu0 %v5384_v52  ;;  %v5462_v52 = vld [vmem:[%s6022_s24 + $0x5fc] ss:$36 sps:$4 sm:$0xff]  }
 0x1ba   : > { %4144 = vmatpush1.bf16.msra.mxu1 %v5425_v17  ;;  %v5494_v17 = vld [vmem:[%s6022_s24 + $0xe0] ss:$36 sps:$4 sm:$0xff]  }
 0x1bb   : > { %4146 = vmatprep.subr.bf16.mxu1 %v5429_v19  ;;  %v5497_v19 = vld [vmem:[%s6022_s24 + $0x12c] ss:$36 sps:$4 sm:$0xff]  }
 0x1bc   : > { %4308 = vmatpush1.bf16.msra.mxu0 %v5386_v54  ;;  %v5464_v54 = vld [vmem:[%s6022_s24 + $0x5f8] ss:$36 sps:$4 sm:$0xff]  }
 0x1bd   : > { %4310 = vmatprep.subr.bf16.mxu0 %v5390_v56  ;;  %v5468_v56 = vld [vmem:[%s6022_s24 + $0x644] ss:$36 sps:$4 sm:$0xff]  }
 0x1c0   : > { %4312 = vmatpush1.bf16.msra.mxu0 %v5392_v57  ;;  %v5467_v57 = vld [vmem:[%s6022_s24 + $0x630] ss:$36 sps:$4 sm:$0xff]  }
 0x1c1   : > { %4314 = vmatprep.subr.bf16.mxu0 %v5396_v58  ;;  %v5470_v58 = vld [vmem:[%s6022_s24 + $0x640] ss:$36 sps:$4 sm:$0xff]  }
 0x1c4   : > { %4316 = vmatpush1.bf16.msra.mxu0 %v5398_v62  ;;  %v5476_v62 = vld [vmem:[%s6022_s24 + $0x688] ss:$36 sps:$4 sm:$0xff]  }
 0x1c5   : > { %4318 = vmatprep.subr.bf16.mxu0 %v5402_v63  ;;  %v5477_v63 = vld [vmem:[%s6022_s24 + $0xc] ss:$36 sps:$4 sm:$0xff]  }
 0x1c8   : > { %4320 = vmatpush1.bf16.msra.mxu0 %v5404_v2  ;;  %v5479_v2 = vld [vmem:[%s6022_s24 + $0x8] ss:$36 sps:$4 sm:$0xff]  }
 0x1c9   : > { %4322 = vmatprep.subr.bf16.mxu0 %v5408_v3 }
 0x1cc   : > { %4324 = vmatpush1.bf16.msra.mxu0 %v5410_v4  ;;  %v5481_v4 = vld [vmem:[%s6022_s24 + $0x20] ss:$36 sps:$4 sm:$0xff]  }
 0x1cd   : > { %4326 = vmatprep.subr.bf16.mxu0 %v5414_v6  ;;  %v5482_v6 = vld [vmem:[%s6022_s24 + $0x54] ss:$36 sps:$4 sm:$0xff]  }
 0x1d0   : > { %4328 = vmatpush1.bf16.msra.mxu0 %v5416_v7  ;;  %v5485_v7 = vld [vmem:[%s6022_s24 + $0x2a8] ss:$36 sps:$4 sm:$0xff]  }
 0x1d1   : > { %4330 = vmatprep.subr.bf16.mxu0 %v5420_v8  ;;  %v5484_v8 = vld [vmem:[%s6022_s24 + $0x50] ss:$36 sps:$4 sm:$0xff]  }
 0x1d3   : > { %v3499_v11 = vpop.f32.mrb[6].mxu1 }
 0x1d4   : > { %4332 = vmatpush1.bf16.msra.mxu0 %v5422_v10  ;;  %v3500_v12 = vpop.f32.mrb[7].mxu1  ;;  %v5486_v10 = vld [vmem:[%s6022_s24 + $0x68] ss:$36 sps:$4 sm:$0xff]  }
 0x1d5   : > { %v3501_v13 = vadd.f32 %v3500_v12, %v3499_v11  ;;  %4334 = vmatprep.subr.bf16.mxu0 %v5426_v5  ;;  %v5487_v11 = vld [vmem:[%s6022_s24 + $0x9c] ss:$36 sps:$4 sm:$0xff]   ;;  %v5490_v12 = vld [vmem:[%s6022_s24 + $0x2f0] ss:$36 sps:$4 sm:$0xff]  }
 0x1d6   : > { %v5495_v5 = vld [vmem:[%s6022_s24 + $0x338] ss:$36 sps:$4 sm:$0xff]  }
 0x1d7   : > { %v2415_v14 = vadd.f32 %v3501_v13, %v2345_v1  ;;  %v5480_v1 = vld [vmem:[%s6022_s24 + $0x260] ss:$36 sps:$4 sm:$0xff]   ;;  %v5489_v13 = vld [vmem:[%s6022_s24 + $0x98] ss:$36 sps:$4 sm:$0xff]  }
 0x1d8   : > { %4336 = vmatpush1.bf16.msra.mxu0 %v5428_v18  ;;  %v5496_v18 = vld [vmem:[%s6022_s24 + $0xf8] ss:$36 sps:$4 sm:$0xff]  }
 0x1d9   : > { %4338 = vmatprep.subr.bf16.mxu0 %v5432_v20  ;;  %v5500_v20 = vld [vmem:[%s6022_s24 + $0x380] ss:$36 sps:$4 sm:$0xff]  }
 0x1f3   : > { %v2484_v21 = vpop.f32.mrb[8].mxu1 }
 0x1f4   : > { %v6363_v22 = vadd.f32 %v2484_v21, %v2415_v14  ;;  %v3605_v23 = vpop.f32.mrb[9].mxu1  ;;  %v5491_v14 = vld [vmem:[%s6022_s24 + $0xb0] ss:$36 sps:$4 sm:$0xff]   ;;  %v5499_v21 = vld [vmem:[%s6022_s24 + $0x128] ss:$36 sps:$4 sm:$0xff]  }
 0x1f5   : > { %v5502_v23 = vld [vmem:[%s6022_s24 + $0x174] ss:$36 sps:$4 sm:$0xff]  }
 0x1f6   : > { %v6413_v3 = vmax.f32 %v6363_v22, 0.0  ;;  %v5501_v22 = vld [vmem:[%s6022_s24 + $0x140] ss:$36 sps:$4 sm:$0xff]  }
 0x26e   : > { %v2133_v0 = vpop.f32.mrb[0].mxu0 }
 0x26f   : > { %v4521_v28 = vadd.f32 %v2133_v0, %v1771_v26  ;;  %v2135_v29 = vpop.f32.mrb[1].mxu0  ;;  %v5506_v26 = vld [vmem:[%s6022_s24 + $0x188] ss:$36 sps:$4 sm:$0xff]   ;;  %v5510_v0 = vld [vmem:[%s6022_s24 + $0x410] ss:$36 sps:$4 sm:$0xff]  }
 0x270   : > { %v4522_v30 = vadd.f32 %v2135_v29, %v1775_v27  ;;  %v5507_v27 = vld [vmem:[%s6022_s24 + $0x1bc] ss:$36 sps:$4 sm:$0xff]   ;;  %v5511_v29 = vld [vmem:[%s6022_s24 + $0x1d0] ss:$36 sps:$4 sm:$0xff]  }
 0x271   : > { %v6373_v34 = vmax.f32 %v4521_v28, 0.0  ;;  %v5509_v28 = vld [vmem:[%s6022_s24 + $0x1b8] ss:$36 sps:$4 sm:$0xff]  }
 0x272   : > { %v6369_v31 = vmax.f32 %v4522_v30, 0.0  ;;  %v5512_v30 = vld [vmem:[%s6022_s24 + $0x204] ss:$36 sps:$4 sm:$0xff]  }
 0x274   : > { %2564 = vmatprep.mubr.f32.mxu1 %v6369_v31  ;;  %2848 = vmatprep.mubr.f32.mxu0 %v6369_v31 }
 0x275   : > { %2565 = vmatmul.mubr.f32.vlgmr.msra.gmra.mrb[10].mxu1 %v6373_v34  ;;  %2849 = vmatmul.mubr.f32.vlgmr.msra.gmra.mrb[2].mxu0 %v6373_v34 }
 0x276   : > { %4148 = vmatpush1.bf16.msra.mxu1 %v5431_v32  ;;  %4340 = vmatpush1.bf16.msra.mxu0 %v5434_v33  ;;  %v5515_v32 = vld [vmem:[%s6022_s24 + $0x458] ss:$36 sps:$4 sm:$0xff]   ;;  %v5514_v33 = vld [vmem:[%s6022_s24 + $0x200] ss:$36 sps:$4 sm:$0xff]  }
 0x277   : > { %4150 = vmatprep.subr.bf16.mxu1 %v5435_v35  ;;  %4342 = vmatprep.subr.bf16.mxu0 %v5438_v9  ;;  %v5516_v35 = vld [vmem:[%s6022_s24 + $0x218] ss:$36 sps:$4 sm:$0xff]   ;;  %v5517_v9 = vld [vmem:[%s6022_s24 + $0x24c] ss:$36 sps:$4 sm:$0xff]  }
 0x278   : > { %2635 = vmatprep.mubr.f32.mxu1 %v5812_v44  ;;  %2919 = vmatprep.mubr.f32.mxu0 %v5812_v44 }
 0x27a   : > { %4152 = vmatpush1.bf16.msra.mxu1 %v5437_v15  ;;  %4344 = vmatpush1.bf16.msra.mxu0 %v5440_v36  ;;  %v5519_v15 = vld [vmem:[%s6022_s24 + $0x248] ss:$36 sps:$4 sm:$0xff]   ;;  %v5520_v36 = vld [vmem:[%s6022_s24 + $0x4a0] ss:$36 sps:$4 sm:$0xff]  }
 0x27b   : > { %4154 = vmatprep.subr.bf16.mxu1 %v5441_v38  ;;  %4346 = vmatprep.subr.bf16.mxu0 %v5444_v39  ;;  %v5521_v38 = vld [vmem:[%s6022_s24 + $0x294] ss:$36 sps:$4 sm:$0xff]  }
 0x27c   : > { %v5523_v39 = vld [vmem:[%s6022_s24 + $0x290] ss:$36 sps:$4 sm:$0xff]  }
 0x27e   : > { %4156 = vmatpush1.bf16.msra.mxu1 %v5443_v41  ;;  %4348 = vmatpush1.bf16.msra.mxu0 %v5446_v42  ;;  %v5524_v41 = vld [vmem:[%s6022_s24 + $0x4e8] ss:$36 sps:$4 sm:$0xff]   ;;  %v5525_v42 = vld [vmem:[%s6022_s24 + $0x2dc] ss:$36 sps:$4 sm:$0xff]  }
 0x27f   : > { %4158 = vmatprep.subr.bf16.mxu1 %v5447_v43  ;;  %4350 = vmatprep.subr.bf16.mxu0 %v5450_v45  ;;  %v5527_v43 = vld [vmem:[%s6022_s24 + $0x2d8] ss:$36 sps:$4 sm:$0xff]   ;;  %v5528_v45 = vld [vmem:[%s6022_s24 + $0x530] ss:$36 sps:$4 sm:$0xff]  }
 0x282   : > { %4160 = vmatpush1.bf16.msra.mxu1 %v5449_v46  ;;  %4352 = vmatpush1.bf16.msra.mxu0 %v5452_v47  ;;  %v5529_v46 = vld [vmem:[%s6022_s24 + $0x324] ss:$36 sps:$4 sm:$0xff]  }
 0x283   : > { %4162 = vmatprep.subr.bf16.mxu1 %v5453_v48  ;;  %4354 = vmatprep.subr.bf16.mxu0 %v5456_v49  ;;  %v5531_v47 = vld [vmem:[%s6022_s24 + $0x320] ss:$36 sps:$4 sm:$0xff]   ;;  %v5532_v48 = vld [vmem:[%s6022_s24 + $0x578] ss:$36 sps:$4 sm:$0xff]   ;;  %v5533_v49 = vld [vmem:[%s6022_s24 + $0x36c] ss:$36 sps:$4 sm:$0xff]  }
 0x286   : > { %4164 = vmatpush1.bf16.msra.mxu1 %v5455_v50  ;;  %4356 = vmatpush1.bf16.msra.mxu0 %v5458_v51  ;;  %v5535_v50 = vld [vmem:[%s6022_s24 + $0x368] ss:$36 sps:$4 sm:$0xff]   ;;  %v5536_v51 = vld [vmem:[%s6022_s24 + $0x5c0] ss:$36 sps:$4 sm:$0xff]  }
 0x287   : > { %4166 = vmatprep.subr.bf16.mxu1 %v5459_v37  ;;  %4358 = vmatprep.subr.bf16.mxu0 %v5462_v52  ;;  %v5537_v37 = vld [vmem:[%s6022_s24 + $0x3b4] ss:$36 sps:$4 sm:$0xff]  }
 0x288   : > { %v5539_v52 = vld [vmem:[%s6022_s24 + $0x3b0] ss:$36 sps:$4 sm:$0xff]  }
 0x28a   : > { %4168 = vmatpush1.bf16.msra.mxu1 %v5461_v53  ;;  %4360 = vmatpush1.bf16.msra.mxu0 %v5464_v54  ;;  %v5540_v53 = vld [vmem:[%s6022_s24 + $0x608] ss:$36 sps:$4 sm:$0xff]   ;;  %v5541_v54 = vld [vmem:[%s6022_s24 + $0x3fc] ss:$36 sps:$4 sm:$0xff]  }
 0x28b   : > { %4170 = vmatprep.subr.bf16.mxu1 %v5465_v55  ;;  %4362 = vmatprep.subr.bf16.mxu0 %v5468_v56  ;;  %v5543_v55 = vld [vmem:[%s6022_s24 + $0x3f8] ss:$36 sps:$4 sm:$0xff]   ;;  %v5544_v56 = vld [vmem:[%s6022_s24 + $0x650] ss:$36 sps:$4 sm:$0xff]  }
 0x28e   : > { %4172 = vmatpush1.bf16.msra.mxu1 %v5467_v57  ;;  %4364 = vmatpush1.bf16.msra.mxu0 %v5470_v58  ;;  %v5545_v57 = vld [vmem:[%s6022_s24 + $0x444] ss:$36 sps:$4 sm:$0xff]  }
 0x28f   : > { %4174 = vmatprep.subr.bf16.mxu1 %v5471_v59  ;;  %4366 = vmatprep.subr.bf16.mxu0 %v5474_v60  ;;  %v5547_v58 = vld [vmem:[%s6022_s24 + $0x440] ss:$36 sps:$4 sm:$0xff]   ;;  %v5548_v59 = vld [vmem:[%s6022_s24 + $0x698] ss:$36 sps:$4 sm:$0xff]   ;;  %v5549_v60 = vld [vmem:[%s6022_s24 + $0x48c] ss:$36 sps:$4 sm:$0xff]  }
 0x292   : > { %4176 = vmatpush1.bf16.msra.mxu1 %v5473_v61  ;;  %4368 = vmatpush1.bf16.msra.mxu0 %v5476_v62  ;;  %v5551_v61 = vld [vmem:[%s6022_s24 + $0x488] ss:$36 sps:$4 sm:$0xff]   ;;  %v5552_v62 = vld [vmem:[%s6022_s24 + $0x4d4] ss:$36 sps:$4 sm:$0xff]  }
 0x293   : > { %4178 = vmatprep.subr.bf16.mxu1 %v5477_v63  ;;  %4466 = vmatprep.subr.bf16.mxu0 %v5480_v1  ;;  %v5554_v63 = vld [vmem:[%s6022_s24 + $0x4d0] ss:$36 sps:$4 sm:$0xff]   ;;  %v5555_v1 = vld [vmem:[%s6022_s24 + $0x51c] ss:$36 sps:$4 sm:$0xff]  }
 0x295   : > { %2636 = vmatmul.mubr.f32.vlgmr.msra.gmra.mrb[10].mxu1 %v6413_v3  ;;  %2920 = vmatmul.mubr.f32.vlgmr.msra.gmra.mrb[2].mxu0 %v6413_v3 }
 0x296   : > { %4180 = vmatpush1.bf16.msra.mxu1 %v5479_v2  ;;  %2706 = vmatprep.mubr.f32.mxu1 %v6369_v31  ;;  %v5558_v2 = vld [vmem:[%s6022_s24 + $0x564] ss:$36 sps:$4 sm:$0xff]  }
 0x297   : > { %4468 = vmatpush3.bf16.msra.mxu0 %v5481_v4  ;;  %3132 = vmatprep.mubr.f32.mxu0 %v6369_v31  ;;  %v5560_v4 = vld [vmem:[%s6022_s24 + $0x560] ss:$36 sps:$4 sm:$0xff]  }
 0x298   : > { %4182 = vmatprep.subr.bf16.mxu1 %v5482_v6  ;;  %4470 = vmatprep.subr.bf16.mxu0 %v5485_v7  ;;  %v5561_v6 = vld [vmem:[%s6022_s24 + $0x5ac] ss:$36 sps:$4 sm:$0xff]  }
 0x299   : > { %v5563_v7 = vld [vmem:[%s6022_s24 + $0x5a8] ss:$36 sps:$4 sm:$0xff]  }
 0x29a   : > { %4184 = vmatpush1.bf16.msra.mxu1 %v5484_v8  ;;  %v5564_v8 = vld [vmem:[%s6022_s24 + $0x5f4] ss:$36 sps:$4 sm:$0xff]  }
 0x29b   : > { %4472 = vmatpush3.bf16.msra.mxu0 %v5486_v10  ;;  %4186 = vmatprep.subr.bf16.mxu1 %v5487_v11  ;;  %v5566_v10 = vld [vmem:[%s6022_s24 + $0x5f0] ss:$36 sps:$4 sm:$0xff]   ;;  %v5567_v11 = vld [vmem:[%s6022_s24 + $0x63c] ss:$36 sps:$4 sm:$0xff]  }
 0x29c   : > { %4474 = vmatprep.subr.bf16.mxu0 %v5490_v12  ;;  %v5569_v12 = vld [vmem:[%s6022_s24 + $0x638] ss:$36 sps:$4 sm:$0xff]  }
 0x29e   : > { %4188 = vmatpush1.bf16.msra.mxu1 %v5489_v13  ;;  %v5570_v13 = vld [vmem:[%s6022_s24 + $0x684] ss:$36 sps:$4 sm:$0xff]  }
 0x29f   : > { %4476 = vmatpush3.bf16.msra.mxu0 %v5491_v14  ;;  %4190 = vmatprep.subr.bf16.mxu1 %v5492_v16  ;;  %v5572_v14 = vld [vmem:[%s6022_s24 + $0x680] ss:$36 sps:$4 sm:$0xff]  }
 0x2a0   : > { %4478 = vmatprep.subr.bf16.mxu0 %v5495_v5  ;;  %v5573_v16 = vld [vmem:[%s6022_s24 + $0x1c] ss:$36 sps:$4 sm:$0xff]  }
 0x2a1   : > { %v5575_v5 = vld [vmem:[%s6022_s24 + $0x18] ss:$36 sps:$4 sm:$0xff]  }
 0x2a2   : > { %4192 = vmatpush1.bf16.msra.mxu1 %v5494_v17  ;;  %v5576_v17 = vld [vmem:[%s6022_s24 + $0x64] ss:$36 sps:$4 sm:$0xff]  }
 0x2a3   : > { %4480 = vmatpush3.bf16.msra.mxu0 %v5496_v18  ;;  %4194 = vmatprep.subr.bf16.mxu1 %v5497_v19  ;;  %v5578_v18 = vld [vmem:[%s6022_s24 + $0x60] ss:$36 sps:$4 sm:$0xff]   ;;  %v5579_v19 = vld [vmem:[%s6022_s24 + $0xac] ss:$36 sps:$4 sm:$0xff]  }
 0x2a4   : > { %4482 = vmatprep.subr.bf16.mxu0 %v5500_v20  ;;  %v5581_v20 = vld [vmem:[%s6022_s24 + $0xa8] ss:$36 sps:$4 sm:$0xff]  }
 0x2a6   : > { %4196 = vmatpush1.bf16.msra.mxu1 %v5499_v21  ;;  %v5582_v21 = vld [vmem:[%s6022_s24 + $0xf4] ss:$36 sps:$4 sm:$0xff]  }
 0x2a7   : > { %4484 = vmatpush3.bf16.msra.mxu0 %v5501_v22  ;;  %4198 = vmatprep.subr.bf16.mxu1 %v5502_v23  ;;  %v5584_v22 = vld [vmem:[%s6022_s24 + $0xf0] ss:$36 sps:$4 sm:$0xff]   ;;  %v5585_v23 = vld [vmem:[%s6022_s24 + $0x13c] ss:$36 sps:$4 sm:$0xff]  }
 0x2a8   : > { %4486 = vmatprep.subr.bf16.mxu0 %v5505_v24  ;;  %v5587_v24 = vld [vmem:[%s6022_s24 + $0x138] ss:$36 sps:$4 sm:$0xff]  }
 0x2aa   : > { %4200 = vmatpush1.bf16.msra.mxu1 %v5504_v25  ;;  %v5590_v25 = vld [vmem:[%s6022_s24 + $0x180] ss:$36 sps:$4 sm:$0xff]  }
 0x2ab   : > { %4488 = vmatpush3.bf16.msra.mxu0 %v5506_v26  ;;  %4202 = vmatprep.subr.bf16.mxu1 %v5507_v27  ;;  %v5591_v26 = vld [vmem:[%s6022_s24 + $0x1cc] ss:$36 sps:$4 sm:$0xff]  }
 0x2ac   : > { %4490 = vmatprep.subr.bf16.mxu0 %v5510_v0  ;;  %v5593_v27 = vld [vmem:[%s6022_s24 + $0x1c8] ss:$36 sps:$4 sm:$0xff]   ;;  %v5594_v0 = vld [vmem:[%s6022_s24 + $0x214] ss:$36 sps:$4 sm:$0xff]  }
 0x2ae   : > { %4204 = vmatpush1.bf16.msra.mxu1 %v5509_v28  ;;  %v5596_v28 = vld [vmem:[%s6022_s24 + $0x210] ss:$36 sps:$4 sm:$0xff]  }
 0x2af   : > { %4492 = vmatpush3.bf16.msra.mxu0 %v5511_v29  ;;  %4206 = vmatprep.subr.bf16.mxu1 %v5512_v30  ;;  %v5597_v29 = vld [vmem:[%s6022_s24 + $0x25c] ss:$36 sps:$4 sm:$0xff]  }
 0x2b0   : > { %4494 = vmatprep.subr.bf16.mxu0 %v5515_v32  ;;  %v5599_v30 = vld [vmem:[%s6022_s24 + $0x258] ss:$36 sps:$4 sm:$0xff]   ;;  %v5600_v32 = vld [vmem:[%s6022_s24 + $0x2a4] ss:$36 sps:$4 sm:$0xff]  }
 0x2b2   : > { %4208 = vmatpush1.bf16.msra.mxu1 %v5514_v33  ;;  %v5602_v33 = vld [vmem:[%s6022_s24 + $0x2a0] ss:$36 sps:$4 sm:$0xff]  }
 0x2b3   : > { %4496 = vmatpush3.bf16.msra.mxu0 %v5516_v35  ;;  %4210 = vmatprep.subr.bf16.mxu1 %v5517_v9  ;;  %v5603_v35 = vld [vmem:[%s6022_s24 + $0x2ec] ss:$36 sps:$4 sm:$0xff]  }
 0x2b4   : > { %4497 = vmatprep.subr.bf16.mxu0 %v5810_v40  ;;  %v5605_v9 = vld [vmem:[%s6022_s24 + $0x2e8] ss:$36 sps:$4 sm:$0xff]  }
 0x2b6   : > { %3133 = vmatmul.mubr.f32.vlgmr.msra.gmra.mrb[4].mxu0 %v6373_v34  ;;  %4212 = vmatpush1.bf16.msra.mxu1 %v5519_v15  ;;  %v5606_v15 = vld [vmem:[%s6022_s24 + $0x334] ss:$36 sps:$4 sm:$0xff]  }
 0x2b7   : > { %4499 = vmatpush3.bf16.msra.mxu0 %v5520_v36  ;;  %4214 = vmatprep.subr.bf16.mxu1 %v5521_v38  ;;  %v5608_v36 = vld [vmem:[%s6022_s24 + $0x330] ss:$36 sps:$4 sm:$0xff]   ;;  %v5609_v38 = vld [vmem:[%s6022_s24 + $0x37c] ss:$36 sps:$4 sm:$0xff]  }
 0x2b8   : > { %4500 = vmatprep.subr.bf16.mxu0 %v5810_v40  ;;  %3638 = vmatprep.mubr.msk.f32.mxu0 %vm5811_vm0, %v5812_v44 }
 0x2ba   : > { %4216 = vmatpush1.bf16.msra.mxu1 %v5523_v39  ;;  %v5611_v39 = vld [vmem:[%s6022_s24 + $0x378] ss:$36 sps:$4 sm:$0xff]  }
 0x2bb   : > { %4502 = vmatpush3.bf16.msra.mxu0 %v5524_v41  ;;  %4218 = vmatprep.subr.bf16.mxu1 %v5525_v42  ;;  %v5612_v41 = vld [vmem:[%s6022_s24 + $0x3c4] ss:$36 sps:$4 sm:$0xff]  }
 0x2bc   : > { %4503 = vmatprep.subr.bf16.mxu0 %v5810_v40  ;;  %v5614_v42 = vld [vmem:[%s6022_s24 + $0x3c0] ss:$36 sps:$4 sm:$0xff]  }
 0x2be   : > { %4220 = vmatpush1.bf16.msra.mxu1 %v5527_v43  ;;  %v5615_v43 = vld [vmem:[%s6022_s24 + $0x40c] ss:$36 sps:$4 sm:$0xff]  }
 0x2bf   : > { %4505 = vmatpush3.bf16.msra.mxu0 %v5528_v45  ;;  %4222 = vmatprep.subr.bf16.mxu1 %v5529_v46  ;;  %v5617_v45 = vld [vmem:[%s6022_s24 + $0x408] ss:$36 sps:$4 sm:$0xff]   ;;  %v5618_v46 = vld [vmem:[%s6022_s24 + $0x454] ss:$36 sps:$4 sm:$0xff]  }
 0x2c0   : > { %4506 = vmatprep.subr.bf16.mxu0 %v5810_v40 }
 0x2c2   : > { %4224 = vmatpush1.bf16.msra.mxu1 %v5531_v47  ;;  %v5620_v47 = vld [vmem:[%s6022_s24 + $0x450] ss:$36 sps:$4 sm:$0xff]  }
 0x2c3   : > { %4508 = vmatpush3.bf16.msra.mxu0 %v5532_v48  ;;  %4226 = vmatprep.subr.bf16.mxu1 %v5533_v49  ;;  %v5621_v48 = vld [vmem:[%s6022_s24 + $0x49c] ss:$36 sps:$4 sm:$0xff]  }
 0x2c4   : > { %4509 = vmatprep.subr.bf16.mxu0 %v5810_v40  ;;  %v5623_v49 = vld [vmem:[%s6022_s24 + $0x498] ss:$36 sps:$4 sm:$0xff]  }
 0x2c6   : > { %4228 = vmatpush1.bf16.msra.mxu1 %v5535_v50  ;;  %v5624_v50 = vld [vmem:[%s6022_s24 + $0x4e4] ss:$36 sps:$4 sm:$0xff]  }
 0x2c7   : > { %4511 = vmatpush3.bf16.msra.mxu0 %v5536_v51  ;;  %4230 = vmatprep.subr.bf16.mxu1 %v5537_v37  ;;  %v5626_v51 = vld [vmem:[%s6022_s24 + $0x4e0] ss:$36 sps:$4 sm:$0xff]   ;;  %v5627_v37 = vld [vmem:[%s6022_s24 + $0x52c] ss:$36 sps:$4 sm:$0xff]  }
 0x2c8   : > { %4512 = vmatprep.subr.bf16.mxu0 %v5810_v40 }
 0x2ca   : > { %4232 = vmatpush1.bf16.msra.mxu1 %v5539_v52  ;;  %v5629_v52 = vld [vmem:[%s6022_s24 + $0x528] ss:$36 sps:$4 sm:$0xff]  }
 0x2cb   : > { %4514 = vmatpush3.bf16.msra.mxu0 %v5540_v53  ;;  %4234 = vmatprep.subr.bf16.mxu1 %v5541_v54  ;;  %v5630_v53 = vld [vmem:[%s6022_s24 + $0x574] ss:$36 sps:$4 sm:$0xff]  }
 0x2cc   : > { %4515 = vmatprep.subr.bf16.mxu0 %v5810_v40  ;;  %v5632_v54 = vld [vmem:[%s6022_s24 + $0x570] ss:$36 sps:$4 sm:$0xff]  }
 0x2ce   : > { %4236 = vmatpush1.bf16.msra.mxu1 %v5543_v55  ;;  %v5635_v55 = vld [vmem:[%s6022_s24 + $0x5b8] ss:$36 sps:$4 sm:$0xff]  }
 0x2cf   : > { %4517 = vmatpush3.bf16.msra.mxu0 %v5544_v56  ;;  %4238 = vmatprep.subr.bf16.mxu1 %v5545_v57  ;;  %v5636_v56 = vld [vmem:[%s6022_s24 + $0x604] ss:$36 sps:$4 sm:$0xff]   ;;  %v5639_v57 = vld [vmem:[%s6022_s24 + $0x64c] ss:$36 sps:$4 sm:$0xff]  }
 0x2d0   : > { %4518 = vmatprep.subr.bf16.mxu0 %v5810_v40  ;;  %v5557_v40 = vld [vmem:[%s6022_s24 + $0x518] ss:$36 sps:$4 sm:$0xff]  }
 0x2d2   : > { %4240 = vmatpush1.bf16.msra.mxu1 %v5547_v58  ;;  %v5641_v58 = vld [vmem:[%s6022_s24 + $0x648] ss:$36 sps:$4 sm:$0xff]  }
 0x2d3   : > { %4520 = vmatpush3.bf16.msra.mxu0 %v5548_v59  ;;  %4242 = vmatprep.subr.bf16.mxu1 %v5549_v60  ;;  %v5642_v59 = vld [vmem:[%s6022_s24 + $0x694] ss:$36 sps:$4 sm:$0xff]  }
 0x2d4   : > { %v5644_v60 = vld [vmem:[%s6022_s24 + $0x690] ss:$36 sps:$4 sm:$0xff]  }
 0x2d5   : > { %2707 = vmatmul.mubr.f32.vlgmr.msra.gmra.mrb[12].mxu1 %v6373_v34 }
 0x2d6   : > { %3639 = vmatmul.mubr.f32.vlgmr.msra.gmra.mrb[6].mxu0 %v6413_v3  ;;  %4244 = vmatpush1.bf16.msra.mxu1 %v5551_v61  ;;  %v2491_v61 = vld [vmem:[#allocation2] sm:$0xff] }
 0x2d7   : > { %4246 = vmatprep.subr.bf16.mxu1 %v5552_v62  ;;  %2777 = vmatprep.mubr.f32.mxu1 %v5812_v44  ;;  %v2495_v62 = vld [vmem:[#allocation2 + $0x20] sm:$0xff] }
 0x2da   : > { %4248 = vmatpush1.bf16.msra.mxu1 %v5554_v63  ;;  %v2492_v63 = vld [vmem:[#allocation2 + $0x8] sm:$0xff] }
 0x2db   : > { %4250 = vmatprep.subr.bf16.mxu1 %v5555_v1  ;;  %v2496_v1 = vld [vmem:[#allocation2 + $0x28] sm:$0xff] }
 0x2de   : > { %4252 = vmatpush1.bf16.msra.mxu1 %v5557_v40 }
 0x2df   : > { %4254 = vmatprep.subr.bf16.mxu1 %v5558_v2 }
 0x2e2   : > { %4256 = vmatpush1.bf16.msra.mxu1 %v5560_v4 }
 0x2e3   : > { %4258 = vmatprep.subr.bf16.mxu1 %v5561_v6 }
 0x2e6   : > { %4260 = vmatpush1.bf16.msra.mxu1 %v5563_v7 }
 0x2e7   : > { %4262 = vmatprep.subr.bf16.mxu1 %v5564_v8 }
 0x2ea   : > { %4264 = vmatpush1.bf16.msra.mxu1 %v5566_v10 }
 0x2eb   : > { %4266 = vmatprep.subr.bf16.mxu1 %v5567_v11 }
 0x2ee   : > { %4268 = vmatpush1.bf16.msra.mxu1 %v5569_v12 }
 0x2ef   : > { %4270 = vmatprep.subr.bf16.mxu1 %v5570_v13 }
 0x2f2   : > { %4272 = vmatpush1.bf16.msra.mxu1 %v5572_v14 }
 0x2f3   : > { %4370 = vmatprep.subr.bf16.mxu1 %v5573_v16 }
 0x2f5   : > { %2778 = vmatmul.mubr.f32.vlgmr.msra.gmra.mrb[12].mxu1 %v6413_v3 }
 0x2f6   : > { %4372 = vmatpush1.bf16.msra.mxu1 %v5575_v5  ;;  %2990 = vmatprep.mubr.f32.mxu1 %v6369_v31  ;;  %v5588_v31 = vld [vmem:[%s6022_s24 + $0x184] ss:$36 sps:$4 sm:$0xff]  }
 0x2f7   : > { %4374 = vmatprep.subr.bf16.mxu1 %v5576_v17 }
 0x2fa   : > { %4376 = vmatpush1.bf16.msra.mxu1 %v5578_v18 }
 0x2fb   : > { %4378 = vmatprep.subr.bf16.mxu1 %v5579_v19  ;;  %v2493_v19 = vld [vmem:[#allocation2 + $0x10] sm:$0xff] }
 0x2fe   : > { %4380 = vmatpush1.bf16.msra.mxu1 %v5581_v20  ;;  %v2494_v20 = vld [vmem:[#allocation2 + $0x18] sm:$0xff] }
 0x2ff   : > { %4382 = vmatprep.subr.bf16.mxu1 %v5582_v21 }
 0x302   : > { %4384 = vmatpush1.bf16.msra.mxu1 %v5584_v22 }
 0x303   : > { %4386 = vmatprep.subr.bf16.mxu1 %v5585_v23 }
 0x306   : > { %4388 = vmatpush1.bf16.msra.mxu1 %v5587_v24 }
 0x307   : > { %4390 = vmatprep.subr.bf16.mxu1 %v5588_v31  ;;  %v2497_v31 = vld [vmem:[#allocation2 + $0x30] sm:$0xff] }
 0x30a   : > { %4392 = vmatpush1.bf16.msra.mxu1 %v5590_v25  ;;  %v2498_v25 = vld [vmem:[#allocation2 + $0x38] sm:$0xff] }
 0x30b   : > { %4394 = vmatprep.subr.bf16.mxu1 %v5591_v26 }
 0x30e   : > { %4396 = vmatpush1.bf16.msra.mxu1 %v5593_v27 }
 0x30f   : > { %4398 = vmatprep.subr.bf16.mxu1 %v5594_v0 }
 0x312   : > { %4400 = vmatpush1.bf16.msra.mxu1 %v5596_v28 }
 0x313   : > { %4402 = vmatprep.subr.bf16.mxu1 %v5597_v29 }
 0x316   : > { %4404 = vmatpush1.bf16.msra.mxu1 %v5599_v30 }
 0x317   : > { %4406 = vmatprep.subr.bf16.mxu1 %v5600_v32 }
 0x31a   : > { %4408 = vmatpush1.bf16.msra.mxu1 %v5602_v33 }
 0x31b   : > { %4410 = vmatprep.subr.bf16.mxu1 %v5603_v35 }
 0x31e   : > { %4412 = vmatpush1.bf16.msra.mxu1 %v5605_v9 }
 0x31f   : > { %4414 = vmatprep.subr.bf16.mxu1 %v5606_v15 }
 0x322   : > { %4416 = vmatpush1.bf16.msra.mxu1 %v5608_v36 }
 0x323   : > { %4418 = vmatprep.subr.bf16.mxu1 %v5609_v38 }
 0x326   : > { %4420 = vmatpush1.bf16.msra.mxu1 %v5611_v39 }
 0x327   : > { %4422 = vmatprep.subr.bf16.mxu1 %v5612_v41 }
 0x32a   : > { %4424 = vmatpush1.bf16.msra.mxu1 %v5614_v42 }
 0x32b   : > { %4426 = vmatprep.subr.bf16.mxu1 %v5615_v43 }
 0x32e   : > { %4428 = vmatpush1.bf16.msra.mxu1 %v5617_v45 }
 0x32f   : > { %4430 = vmatprep.subr.bf16.mxu1 %v5618_v46 }
 0x332   : > { %4432 = vmatpush1.bf16.msra.mxu1 %v5620_v47 }
 0x333   : > { %4434 = vmatprep.subr.bf16.mxu1 %v5621_v48 }
 0x335   : > { %2991 = vmatmul.mubr.f32.vlgmr.msra.gmra.mrb[14].mxu1 %v6373_v34  ;;  %v5633_v34 = vld [vmem:[%s6022_s24 + $0x5bc] ss:$36 sps:$4 sm:$0xff]  }
 0x336   : > { %4436 = vmatpush1.bf16.msra.mxu1 %v5623_v49  ;;  %3061 = vmatprep.mubr.f32.mxu1 %v5812_v44  ;;  %v5638_v44 = vld [vmem:[%s6022_s24 + $0x600] ss:$36 sps:$4 sm:$0xff]  }
 0x337   : > { %4438 = vmatprep.subr.bf16.mxu1 %v5624_v50 }
 0x33a   : > { %4440 = vmatpush1.bf16.msra.mxu1 %v5626_v51 }
 0x33b   : > { %4442 = vmatprep.subr.bf16.mxu1 %v5627_v37 }
 0x33e   : > { %4444 = vmatpush1.bf16.msra.mxu1 %v5629_v52 }
 0x33f   : > { %4446 = vmatprep.subr.bf16.mxu1 %v5630_v53 }
 0x342   : > { %4448 = vmatpush1.bf16.msra.mxu1 %v5632_v54 }
 0x343   : > { %4450 = vmatprep.subr.bf16.mxu1 %v5633_v34 }
 0x346   : > { %4452 = vmatpush1.bf16.msra.mxu1 %v5635_v55 }
 0x347   : > { %4454 = vmatprep.subr.bf16.mxu1 %v5636_v56 }
 0x34a   : > { %4456 = vmatpush1.bf16.msra.mxu1 %v5638_v44 }
 0x34b   : > { %4458 = vmatprep.subr.bf16.mxu1 %v5639_v57 }
 0x34e   : > { %4460 = vmatpush1.bf16.msra.mxu1 %v5641_v58 }
 0x34f   : > { %4462 = vmatprep.subr.bf16.mxu1 %v5642_v59 }
 0x352   : > { %4464 = vmatpush1.bf16.msra.mxu1 %v5644_v60 }
 0x355   : > { %3062 = vmatmul.mubr.f32.vlgmr.msra.gmra.mrb[14].mxu1 %v6413_v3  ;;  %v2499_v3 = vld [vmem:[#allocation2 + $0x40] sm:$0xff] }
 0x368   : > { %v2637_v40 = vpop.f32.mrb[10].mxu1  ;;  %v2921_v2 = vpop.f32.mrb[2].mxu0 }
 0x369   : > { %v3208_v4 = vadd.f32 %v2637_v40, %v2491_v61  ;;  %v3212_v6 = vadd.f32 %v2921_v2, %v2495_v62  ;;  %v2639_v7 = vpop.f32.mrb[11].mxu1  ;;  %v2923_v8 = vpop.f32.mrb[3].mxu0 }
 0x36a   : > { %v3209_v10 = vadd.f32 %v2639_v7, %v2492_v63  ;;  %v3213_v11 = vadd.f32 %v2923_v8, %v2496_v1 }
 0x36b   : > { %3217 = vst [vmem:[#allocation2] sm:$0xff] %v3208_v4  ;;  %3221 = vst [vmem:[#allocation2 + $0x20] sm:$0xff] %v3212_v6 }
 0x36c   : > { %3218 = vst [vmem:[#allocation2 + $0x8] sm:$0xff] %v3209_v10  ;;  %3222 = vst [vmem:[#allocation2 + $0x28] sm:$0xff] %v3213_v11 }
 0x372   : > { %v3230_v29 = vld [vmem:[#allocation2] sm:$0xff] (!%p3356_p6) }
 0x373   : > { %v3231_v30 = vld [vmem:[#allocation2 + $0x8] sm:$0xff] (!%p3356_p6)  ;;  %3239 = vst [vmem:[#allocation9] sm:$0xff] (!%p3356_p6), %v3230_v29  ;;  %v3234_v35 = vld [vmem:[#allocation2 + $0x20] sm:$0xff] (!%p3356_p6) }
 0x374   : > { %3240 = vst [vmem:[#allocation9 + $0x8] sm:$0xff] (!%p3356_p6), %v3231_v30  ;;  %v3235_v9 = vld [vmem:[#allocation2 + $0x28] sm:$0xff] (!%p3356_p6)  ;;  %3243 = vst [vmem:[#allocation9 + $0x20] sm:$0xff] (!%p3356_p6), %v3234_v35 }
 0x375   : > { %3244 = vst [vmem:[#allocation9 + $0x28] sm:$0xff] (!%p3356_p6), %v3235_v9 }
 0x389   : > { %v3551_v12 = vpop.f32.mrb[4].mxu0 }
 0x38a   : > { %v3552_v13 = vpop.f32.mrb[5].mxu0 }
 0x38b   : > { %v3553_v14 = vadd.f32 %v3552_v13, %v3551_v12 }
 0x3a9   : > { %v3204_v16 = vpop.f32.mrb[6].mxu0 }
 0x3aa   : > { %v3205_v5 = vadd.f32 %v3553_v14, %v3204_v16  ;;  %v3640_v17 = vpop.f32.mrb[7].mxu0 }
 0x3ac   : > { %v3216_v18 = vadd.f32 %v3205_v5, %v2499_v3 }
 0x3ae   : > { %3225 = vst [vmem:[#allocation2 + $0x40] sm:$0xff] %v3216_v18 }
 0x3b5   : > { %v3238_v38 = vld [vmem:[#allocation2 + $0x40] sm:$0xff] (!%p3356_p6) }
 0x3b6   : > { %3247 = vst [vmem:[#allocation9 + $0x40] sm:$0xff] (!%p3356_p6), %v3238_v38 }
 0x3c8   : > { %v2779_v21 = vpop.f32.mrb[12].mxu1 }
 0x3c9   : > { %v3210_v22 = vadd.f32 %v2779_v21, %v2493_v19  ;;  %v2781_v23 = vpop.f32.mrb[13].mxu1 }
 0x3ca   : > { %v3211_v24 = vadd.f32 %v2781_v23, %v2494_v20 }
 0x3cb   : > { %3219 = vst [vmem:[#allocation2 + $0x10] sm:$0xff] %v3210_v22 }
 0x3cc   : > { %3220 = vst [vmem:[#allocation2 + $0x18] sm:$0xff] %v3211_v24 }
 0x3d2   : > { %v3232_v32 = vld [vmem:[#allocation2 + $0x10] sm:$0xff] (!%p3356_p6) }
 0x3d3   : > { %3241 = vst [vmem:[#allocation9 + $0x10] sm:$0xff] (!%p3356_p6), %v3232_v32  ;;  %v3233_v33 = vld [vmem:[#allocation2 + $0x18] sm:$0xff] (!%p3356_p6) }
 0x3d4   : > { %3242 = vst [vmem:[#allocation9 + $0x18] sm:$0xff] (!%p3356_p6), %v3233_v33 }
 0x426   : > { %3229 = sbr.rel (%p3356_p6) target bundleno = 1077 (0x435), region = 60 }
 0x428   : > { %v3063_v26 = vpop.f32.mrb[14].mxu1 }
 0x429   : > { %v3214_v27 = vadd.f32 %v3063_v26, %v2497_v31  ;;  %v3065_v0 = vpop.f32.mrb[15].mxu1 }
 0x42a   : > { %v3215_v28 = vadd.f32 %v3065_v0, %v2498_v25 }
 0x42b   : > { %3223 = vst [vmem:[#allocation2 + $0x30] sm:$0xff] %v3214_v27 }
 0x42c   : > { %3224 = vst [vmem:[#allocation2 + $0x38] sm:$0xff] %v3215_v28 }
 0x432   : > { %v3236_v15 = vld [vmem:[#allocation2 + $0x30] sm:$0xff] }
 0x433   : > { %v3237_v36 = vld [vmem:[#allocation2 + $0x38] sm:$0xff]  ;;  %3245 = vst [vmem:[#allocation9 + $0x30] sm:$0xff] %v3236_v15 }
 0x434   : > { %3246 = vst [vmem:[#allocation9 + $0x38] sm:$0xff] %v3237_v36 }
 0x435 PF: > { %p5002_p0 = scmp.eq.s32.totalorder %s5924_s9, 2  ;;  %s5813_s28 = smov [#allocation9]  }
 0x436   : > { %s3255_s7 = sshll.u32 %s5813_s28, 4  ;;  %s3256_s7 = int_to_ptr.vmem [resolvable:$true] %s3255_s7 }
 0x437   : > { %s5733_s8 = scalar_lea.vmem %s3256_s7, 1152  ;;  %p5740_p11 = scmp.lt.s32.totalorder %s3256_s7, %s3256_s7 }
 0x438   : > { %p5734_p4 = scmp.ne.s32.totalorder %s3256_s7, %s5733_s8  ;;  %p5741_p5 = scmp.lt.s32.totalorder %s5733_s8, %s5733_s8 }
 0x43a   : > { %p5735_p8 = pnand %p5734_p4, %p5002_p0  ;;  %p5742_p7 = por %p5741_p5, %p5740_p11 }
 0x43c   : > { %p5736_p1 = pneg %p5735_p8 }
 0x43e   : > { %p5743_p12 = pnand %p5742_p7, %p5736_p1 }
 0x440   : > { %5746 = shalt.err (!%p5743_p12)
}
 0x441   : > { %s5747_s29 = scalar_lea.hbm %s6597_s5, 1152 }
 0x442   : > { %p5748_p9 = scmp.ne.s32.totalorder %s6597_s5, %s5747_s29  ;;  %p5753_p10 = scmp.lt.u32.totalorder %s5747_s29, %s6597_s5 }
 0x444   : > { %p5749_p2 = pnand %p5748_p9, %p5002_p0 }
 0x446   : > { %p5750_p3 = pneg %p5749_p2 }
 0x448   : > { %p5755_p13 = pnand %p5753_p10, %p5750_p3 }
 0x44a   : > { %5758 = shalt.err (!%p5755_p13)
}
 0x44b   : > { %4984 = dma.vmem_to_hbm [thread:$0]  (%p5002_p0), %s3256_s7, 1152, %s6597_s5, [#allocation5]  }
 0x44c   : > { %5784 = dma.done.wait (%p5002_p0), [#allocation5], 1152  }
 0x44d   : > { %5786 = vsyncadd (%p5002_p0), [#allocation5], 4294966144 }
 0x44e PF: > { %p17_p6 = scmp.ge.s32.totalorder %s5865_s22, 5   ;;  %s6616_s18 = smov %s5793_s19 }
 0x44f   : > { %s6617_s19 = smov %s5797_s20  ;;  %s6618_s20 = smov %s5875_s25 }
 0x450   : > { %s6619_s21 = smov %s5865_s22  ;;  %19 = sbr.rel (!%p17_p6) target bundleno = 5 (0x5), region = 104 }
 0x457   :  { %3268 = vsyncpa [#allocation4], 1 }
 0x458   :  { %3270 = vsyncpa [#allocation4 + $0x1], 1 }
 0x459   :  { %3271 = vsyncpa [#allocation7], 1 }
 0x45a   :  { %3273 = vsyncpa [#allocation7 + $0x1], 1 }
 0x45b   :  { %3274 = vsyncpa [#allocation5], 1 }
 0x45c   :  { %3276 = vsyncpa [#allocation5 + $0x1], 1 }

</bundles_post_ra>
